<compile_context>
chip_gen: v7x
topology: tpu7x:2x2x1
jax: 0.10.0
libtpu: 0.0.40
codegen_flags: <defaults>
</compile_context>

<pallas_src>
import functools
import math

import jax
import jax.numpy as jnp
import numpy as np
from jax import lax
from jax.experimental import pallas as pl
from jax.experimental.pallas import tpu as pltpu


def _layer_norm(y, gamma, beta, eps):
    # Single pass over y: var = E[y^2] - E[y]^2 ; rsqrt goes to the EUP slot.
    mu = jnp.mean(y, axis=-1, keepdims=True)
    var = jnp.maximum(jnp.mean(y * y, axis=-1, keepdims=True) - mu * mu, 0.0)
    return gamma * ((y - mu) * lax.rsqrt(var + eps)) + beta


def encoder_kernel(xq_ref, xkv_ref, mask_ref,
                   wq_ref, bq_ref, wk_ref, bk_ref, wv_ref, bv_ref,
                   w1_ref, b1_ref, w2_ref, b2_ref,
                   g1_ref, be1_ref, g2_ref, be2_ref,
                   out_ref, probs_ref,
                   k_scratch, v_scratch,
                   *, num_heads, head_dim, eps, compute_dtype):
    qi = pl.program_id(1)
    cd = compute_dtype

    # ---- K / V for the full sequence: computed once per batch element ----
    @pl.when(qi == 0)
    def _():
        x_kv = xkv_ref[0].astype(cd)                                   # (S, H)
        k = jnp.dot(x_kv, wk_ref[...], preferred_element_type=jnp.float32) + bk_ref[...]
        v = jnp.dot(x_kv, wv_ref[...], preferred_element_type=jnp.float32) + bv_ref[...]
        s = k.shape[0]
        # head-major (nH, S, dh): single repack, no per-head lane slicing later
        k_scratch[...] = k.reshape(s, num_heads, head_dim).transpose(1, 0, 2).astype(cd)
        v_scratch[...] = v.reshape(s, num_heads, head_dim).transpose(1, 0, 2).astype(cd)

    x_q = xq_ref[0]                                                    # (TQ, H) f32
    mask = mask_ref[0, 0]                                              # (TQ, S) additive

    # ---- Q projection for this query tile ----
    q = jnp.dot(x_q.astype(cd), wq_ref[...], preferred_element_type=jnp.float32) + bq_ref[...]
    tq = q.shape[0]
    q_h = q.reshape(tq, num_heads, head_dim).transpose(1, 0, 2).astype(cd)   # (nH, TQ, dh)

    k_h = k_scratch[...]                                               # (nH, S, dh)
    v_h = v_scratch[...]

    # ---- attention: all heads batched through one MXU stream ----
    scale = 1.0 / math.sqrt(head_dim)
    scores = jnp.einsum("hqd,hkd->hqk", q_h, k_h,
                        preferred_element_type=jnp.float32) * scale    # (nH, TQ, S) f32
    scores = scores + mask[None, :, :]

    m = jnp.max(scores, axis=-1, keepdims=True)
    e = jnp.exp(scores - m)
    p = e / jnp.sum(e, axis=-1, keepdims=True)                         # f32 softmax
    probs_ref[0] = p.astype(probs_ref.dtype)                           # one contiguous store

    ctx_h = jnp.einsum("hqk,hkd->hqd", p.astype(cd), v_h,
                       preferred_element_type=jnp.float32)             # (nH, TQ, dh)
    ctx = ctx_h.transpose(1, 0, 2).reshape(tq, num_heads * head_dim)   # (TQ, H)

    # ---- sublayer 1: LayerNorm(context) + residual (dropout = identity at eval) ----
    attn_out = _layer_norm(ctx, g1_ref[...], be1_ref[...], eps) + x_q

    # ---- feed-forward: dense_1 -> ReLU -> dense_2 ----
    h1 = jnp.dot(attn_out.astype(cd), w1_ref[...], preferred_element_type=jnp.float32) + b1_ref[...]
    h1 = jnp.maximum(h1, 0.0)
    h2 = jnp.dot(h1.astype(cd), w2_ref[...], preferred_element_type=jnp.float32) + b2_ref[...]

    # ---- sublayer 2 ----
    out_ref[0] = (_layer_norm(h2, g2_ref[...], be2_ref[...], eps) + attn_out).astype(out_ref.dtype)


def encoder_forward(x, attention_mask, params, *, num_heads,
                    compute_dtype=jnp.bfloat16, probs_dtype=jnp.float32, q_tile=128):
    B, S, H = x.shape
    head_dim = H // num_heads
    I = params["w1"].shape[1]
    eps = 1e-12
    cd = jnp.dtype(compute_dtype)

    # Query-tile grid axis (TQ=128 when it divides S; whole sequence otherwise).
    TQ = q_tile if (S % q_tile == 0) else S
    nq = S // TQ

    kernel = functools.partial(encoder_kernel, num_heads=num_heads,
                               head_dim=head_dim, eps=eps, compute_dtype=cd)

    full2 = lambda b, qi: (0, 0)
    weight_specs = [
        pl.BlockSpec((H, H), full2), pl.BlockSpec((1, H), full2),   # wq, bq
        pl.BlockSpec((H, H), full2), pl.BlockSpec((1, H), full2),   # wk, bk
        pl.BlockSpec((H, H), full2), pl.BlockSpec((1, H), full2),   # wv, bv
        pl.BlockSpec((H, I), full2), pl.BlockSpec((1, I), full2),   # w1, b1
        pl.BlockSpec((I, H), full2), pl.BlockSpec((1, H), full2),   # w2, b2
        pl.BlockSpec((1, H), full2), pl.BlockSpec((1, H), full2),   # gamma1, beta1
        pl.BlockSpec((1, H), full2), pl.BlockSpec((1, H), full2),   # gamma2, beta2
    ]

    # Explicit scoped-VMEM limit sized to the block footprint, clamped to v7x physical.
    wbytes = (3 * H * H + H * I + I * H) * cd.itemsize + (3 * H + I + 5 * H) * 4
    bbytes = (TQ * H + S * H + TQ * S + TQ * H) * 4 \
        + num_heads * TQ * S * jnp.dtype(probs_dtype).itemsize
    sbytes = 2 * num_heads * S * head_dim * cd.itemsize
    vmem_limit = int(min(64 * 1024 * 1024,
                         max(32 * 1024 * 1024, 3 * (wbytes + bbytes) + sbytes)))

    out, probs = pl.pallas_call(
        kernel,
        out_shape=(jax.ShapeDtypeStruct((B, S, H), x.dtype),
                   jax.ShapeDtypeStruct((B, num_heads, S, S), probs_dtype)),
        grid=(B, nq),
        in_specs=[pl.BlockSpec((1, TQ, H), lambda b, qi: (b, qi, 0)),      # x (query tile)
                  pl.BlockSpec((1, S, H), lambda b, qi: (b, 0, 0)),        # x (full seq -> K/V)
                  pl.BlockSpec((1, 1, TQ, S), lambda b, qi: (b, 0, qi, 0))  # additive mask
                  ] + weight_specs,
        out_specs=(pl.BlockSpec((1, TQ, H), lambda b, qi: (b, qi, 0)),
                   pl.BlockSpec((1, num_heads, TQ, S), lambda b, qi: (b, 0, qi, 0))),
        scratch_shapes=[pltpu.VMEM((num_heads, S, head_dim), cd),   # K (head-major)
                        pltpu.VMEM((num_heads, S, head_dim), cd)],  # V (head-major)
        compiler_params=pltpu.CompilerParams(
            dimension_semantics=("parallel", "arbitrary"),
            vmem_limit_bytes=vmem_limit),
    )(x, x, attention_mask,
      params["wq"].astype(cd), params["bq"], params["wk"].astype(cd), params["bk"],
      params["wv"].astype(cd), params["bv"],
      params["w1"].astype(cd), params["b1"], params["w2"].astype(cd), params["b2"],
      params["gamma1"], params["beta1"], params["gamma2"], params["beta2"])
    return out, probs


def encoder_reference(x, attention_mask, params, *, num_heads, compute_dtype=jnp.float32):
    """Pure-JAX reference mirroring the PyTorch module (eval, output_attention=True).
    compute_dtype casts matmul inputs (f32 accumulation) to emulate the bf16 MXU path."""
    B, S, H = x.shape
    dh = H // num_heads
    eps = 1e-12
    cd = jnp.dtype(compute_dtype)
    c = lambda a: a.astype(cd)

    def ln(y, g, b):
        u = jnp.mean(y, axis=-1, keepdims=True)
        s = jnp.mean((y - u) ** 2, axis=-1, keepdims=True)
        return g[0] * ((y - u) / jnp.sqrt(s + eps)) + b[0]

    def mm(a, w, b):
        return jnp.dot(c(a), c(w), preferred_element_type=jnp.float32) + b[0]

    q = mm(x, params["wq"], params["bq"])
    k = mm(x, params["wk"], params["bk"])
    v = mm(x, params["wv"], params["bv"])
    q = c(q).reshape(B, S, num_heads, dh).transpose(0, 2, 1, 3)
    k = c(k).reshape(B, S, num_heads, dh).transpose(0, 2, 1, 3)
    v = c(v).reshape(B, S, num_heads, dh).transpose(0, 2, 1, 3)
    scores = jnp.einsum("bhqd,bhkd->bhqk", q, k,
                        preferred_element_type=jnp.float32) / math.sqrt(dh)
    scores = scores + attention_mask
    probs = jax.nn.softmax(scores, axis=-1)
    ctx = jnp.einsum("bhqk,bhkd->bhqd", c(probs), v, preferred_element_type=jnp.float32)
    ctx = ctx.transpose(0, 2, 1, 3).reshape(B, S, H)
    attn_out = ln(ctx, params["gamma1"], params["beta1"]) + x
    h1 = jnp.maximum(mm(attn_out, params["w1"], params["b1"]), 0.0)
    h2 = mm(h1, params["w2"], params["b2"])
    out = ln(h2, params["gamma2"], params["beta2"]) + attn_out
    return out, probs


if __name__ == "__main__":
    B, S, H, NH, I = 2, 8, 32, 4, 64
    key = jax.random.PRNGKey(0)
    ks = jax.random.split(key, 12)

    def rnd(k, shape, scale=0.05):
        return (scale * jax.random.normal(k, shape)).astype(jnp.float32)

    params = {
        "wq": rnd(ks[0], (H, H)), "bq": rnd(ks[1], (1, H)),
        "wk": rnd(ks[2], (H, H)), "bk": rnd(ks[3], (1, H)),
        "wv": rnd(ks[4], (H, H)), "bv": rnd(ks[5], (1, H)),
        "w1": rnd(ks[6], (H, I)), "b1": rnd(ks[7], (1, I)),
        "w2": rnd(ks[8], (I, H)), "b2": rnd(ks[9], (1, H)),
        "gamma1": jnp.ones((1, H), jnp.float32), "beta1": jnp.zeros((1, H), jnp.float32),
        "gamma2": jnp.ones((1, H), jnp.float32), "beta2": jnp.zeros((1, H), jnp.float32),
    }

    x = jax.random.normal(ks[10], (B, S, H), dtype=jnp.float32)
    # Additive attention mask (B, 1, S, S): mask out the last two key positions of batch 1.
    mask = jnp.zeros((B, 1, S, S), jnp.float32)
    mask = mask.at[1, :, :, -2:].set(-1e9)

    # 1) exact f32 compute path vs. exact reference (semantics check).
    out32, probs32 = encoder_forward(x, mask, params, num_heads=NH,
                                     compute_dtype=jnp.float32)
    out32, probs32 = jax.block_until_ready((out32, probs32))
    ref_out, ref_probs = encoder_reference(x, mask, params, num_heads=NH,
                                           compute_dtype=jnp.float32)
    np.testing.assert_allclose(np.asarray(out32), np.asarray(ref_out), rtol=1e-4, atol=1e-4)
    np.testing.assert_allclose(np.asarray(probs32), np.asarray(ref_probs), rtol=1e-4, atol=1e-4)

    # 2) bf16 MXU path (production default) vs. bf16-emulating reference.
    out16, probs16 = encoder_forward(x, mask, params, num_heads=NH,
                                     compute_dtype=jnp.bfloat16)
    out16, probs16 = jax.block_until_ready((out16, probs16))
    ref_out16, ref_probs16 = encoder_reference(x, mask, params, num_heads=NH,
                                               compute_dtype=jnp.bfloat16)
    np.testing.assert_allclose(np.asarray(out16), np.asarray(ref_out16), rtol=1e-2, atol=1e-2)
    np.testing.assert_allclose(np.asarray(probs16), np.asarray(ref_probs16), rtol=5e-3, atol=5e-3)

    # TODO(synk): the flash_attn_func (output_attention=False) branch, train-mode dropout,
    # and the attention_mask seq-length-mismatch padding branch are not reproduced.
    print("KERNEL_OK")
</pallas_src>

<mosaic_0001>
module attributes {stable_mosaic.version = 11 : i64} {
  func.func @encoder_kernel(%arg0: i32, %arg1: i32, %arg2: memref<1x8x32xf32, #tpu.memory_space<vmem>>, %arg3: memref<1x8x32xf32, #tpu.memory_space<vmem>>, %arg4: memref<1x1x8x8xf32, #tpu.memory_space<vmem>>, %arg5: memref<32x32xf32, #tpu.memory_space<vmem>>, %arg6: memref<1x32xf32, #tpu.memory_space<vmem>>, %arg7: memref<32x32xf32, #tpu.memory_space<vmem>>, %arg8: memref<1x32xf32, #tpu.memory_space<vmem>>, %arg9: memref<32x32xf32, #tpu.memory_space<vmem>>, %arg10: memref<1x32xf32, #tpu.memory_space<vmem>>, %arg11: memref<32x64xf32, #tpu.memory_space<vmem>>, %arg12: memref<1x64xf32, #tpu.memory_space<vmem>>, %arg13: memref<64x32xf32, #tpu.memory_space<vmem>>, %arg14: memref<1x32xf32, #tpu.memory_space<vmem>>, %arg15: memref<1x32xf32, #tpu.memory_space<vmem>>, %arg16: memref<1x32xf32, #tpu.memory_space<vmem>>, %arg17: memref<1x32xf32, #tpu.memory_space<vmem>>, %arg18: memref<1x32xf32, #tpu.memory_space<vmem>>, %arg19: memref<1x8x32xf32, #tpu.memory_space<vmem>>, %arg20: memref<1x4x8x8xf32, #tpu.memory_space<vmem>>, %arg21: memref<4x8x8xf32, #tpu.memory_space<vmem>>, %arg22: memref<4x8x8xf32, #tpu.memory_space<vmem>>) attributes {dimension_semantics = [#tpu.dimension_semantics<parallel>, #tpu.dimension_semantics<arbitrary>], iteration_bounds = array<i64: 2, 1>, scalar_prefetch = 0 : i64, scratch_operands = 2 : i64, tpu.core_type = #tpu.core_type<tc>, window_params = [{transform_indices = @transform_0, window_bounds = array<i64: 1, 8, 32>}, {transform_indices = @transform_1, window_bounds = array<i64: 1, 8, 32>}, {transform_indices = @transform_2, window_bounds = array<i64: 1, 1, 8, 8>}, {pipeline_mode = #tpu.pipeline_mode<synchronous>, transform_indices = @transform_3, window_bounds = array<i64: 32, 32>}, {pipeline_mode = #tpu.pipeline_mode<synchronous>, transform_indices = @transform_4, window_bounds = array<i64: 1, 32>}, {pipeline_mode = #tpu.pipeline_mode<synchronous>, transform_indices = @transform_5, window_bounds = array<i64: 32, 32>}, {pipeline_mode = #tpu.pipeline_mode<synchronous>, transform_indices = @transform_6, window_bounds = array<i64: 1, 32>}, {pipeline_mode = #tpu.pipeline_mode<synchronous>, transform_indices = @transform_7, window_bounds = array<i64: 32, 32>}, {pipeline_mode = #tpu.pipeline_mode<synchronous>, transform_indices = @transform_8, window_bounds = array<i64: 1, 32>}, {pipeline_mode = #tpu.pipeline_mode<synchronous>, transform_indices = @transform_9, window_bounds = array<i64: 32, 64>}, {pipeline_mode = #tpu.pipeline_mode<synchronous>, transform_indices = @transform_10, window_bounds = array<i64: 1, 64>}, {pipeline_mode = #tpu.pipeline_mode<synchronous>, transform_indices = @transform_11, window_bounds = array<i64: 64, 32>}, {pipeline_mode = #tpu.pipeline_mode<synchronous>, transform_indices = @transform_12, window_bounds = array<i64: 1, 32>}, {pipeline_mode = #tpu.pipeline_mode<synchronous>, transform_indices = @transform_13, window_bounds = array<i64: 1, 32>}, {pipeline_mode = #tpu.pipeline_mode<synchronous>, transform_indices = @transform_14, window_bounds = array<i64: 1, 32>}, {pipeline_mode = #tpu.pipeline_mode<synchronous>, transform_indices = @transform_15, window_bounds = array<i64: 1, 32>}, {pipeline_mode = #tpu.pipeline_mode<synchronous>, transform_indices = @transform_16, window_bounds = array<i64: 1, 32>}, {transform_indices = @transform_17, window_bounds = array<i64: 1, 8, 32>}, {transform_indices = @transform_18, window_bounds = array<i64: 1, 4, 8, 8>}]} {
    %c0_i32 = arith.constant 0 : i32
    %0 = arith.cmpi eq, %arg1, %c0_i32 : i32
    %1 = arith.extui %0 : i1 to i32
    %c0_i32_0 = arith.constant 0 : i32
    %2 = arith.cmpi ne, %1, %c0_i32_0 : i32
    scf.if %2 {
      %c0_60 = arith.constant 0 : index
      %c0_61 = arith.constant 0 : index
      %c0_62 = arith.constant 0 : index
      %106 = vector.load %arg3[%c0_60, %c0_61, %c0_62] : memref<1x8x32xf32, #tpu.memory_space<vmem>>, vector<1x8x32xf32>
      %107 = vector.shape_cast %106 : vector<1x8x32xf32> to vector<8x32xf32>
      %c0_63 = arith.constant 0 : index
      %c0_64 = arith.constant 0 : index
      %108 = vector.load %arg7[%c0_63, %c0_64] : memref<32x32xf32, #tpu.memory_space<vmem>>, vector<32x32xf32>
      %cst_65 = arith.constant dense<0.000000e+00> : vector<8x32xf32>
      %109 = tpu.matmul %107, %108, %cst_65 {dimension_numbers = #tpu.dot_dimension_numbers<[1], [0], [0], [1], [0, 0, 1, 1], [], []>} : vector<8x32xf32>, vector<32x32xf32>, vector<8x32xf32> -> vector<8x32xf32>
      %c0_66 = arith.constant 0 : index
      %c0_67 = arith.constant 0 : index
      %110 = vector.load %arg8[%c0_66, %c0_67] : memref<1x32xf32, #tpu.memory_space<vmem>>, vector<1x32xf32>
      %111 = vector.broadcast %110 : vector<1x32xf32> to vector<8x32xf32>
      %112 = arith.addf %109, %111 : vector<8x32xf32>
      %c0_68 = arith.constant 0 : index
      %c0_69 = arith.constant 0 : index
      %113 = vector.load %arg9[%c0_68, %c0_69] : memref<32x32xf32, #tpu.memory_space<vmem>>, vector<32x32xf32>
      %cst_70 = arith.constant dense<0.000000e+00> : vector<8x32xf32>
      %114 = tpu.matmul %107, %113, %cst_70 {dimension_numbers = #tpu.dot_dimension_numbers<[1], [0], [0], [1], [0, 0, 1, 1], [], []>} : vector<8x32xf32>, vector<32x32xf32>, vector<8x32xf32> -> vector<8x32xf32>
      %c0_71 = arith.constant 0 : index
      %c0_72 = arith.constant 0 : index
      %115 = vector.load %arg10[%c0_71, %c0_72] : memref<1x32xf32, #tpu.memory_space<vmem>>, vector<1x32xf32>
      %116 = vector.broadcast %115 : vector<1x32xf32> to vector<8x32xf32>
      %117 = arith.addf %114, %116 : vector<8x32xf32>
      %118 = vector.shape_cast %112 : vector<8x32xf32> to vector<8x4x8xf32>
      %119 = tpu.transpose %118, [1, 0, 2] : vector<8x4x8xf32> -> vector<4x8x8xf32>
      %c0_73 = arith.constant 0 : index
      %c0_74 = arith.constant 0 : index
      %c0_75 = arith.constant 0 : index
      %120 = vector.load %arg21[%c0_73, %c0_74, %c0_75] : memref<4x8x8xf32, #tpu.memory_space<vmem>>, vector<4x8x8xf32>
      tpu.vector_store %arg21[%c0_73, %c0_74, %c0_75], %119 {strides = array<i32>} : memref<4x8x8xf32, #tpu.memory_space<vmem>>, vector<4x8x8xf32>,
      %121 = vector.shape_cast %117 : vector<8x32xf32> to vector<8x4x8xf32>
      %122 = tpu.transpose %121, [1, 0, 2] : vector<8x4x8xf32> -> vector<4x8x8xf32>
      %c0_76 = arith.constant 0 : index
      %c0_77 = arith.constant 0 : index
      %c0_78 = arith.constant 0 : index
      %123 = vector.load %arg22[%c0_76, %c0_77, %c0_78] : memref<4x8x8xf32, #tpu.memory_space<vmem>>, vector<4x8x8xf32>
      tpu.vector_store %arg22[%c0_76, %c0_77, %c0_78], %122 {strides = array<i32>} : memref<4x8x8xf32, #tpu.memory_space<vmem>>, vector<4x8x8xf32>,
    } else {
    }
    %c0 = arith.constant 0 : index
    %c0_1 = arith.constant 0 : index
    %c0_2 = arith.constant 0 : index
    %3 = vector.load %arg2[%c0, %c0_1, %c0_2] : memref<1x8x32xf32, #tpu.memory_space<vmem>>, vector<1x8x32xf32>
    %4 = vector.shape_cast %3 : vector<1x8x32xf32> to vector<8x32xf32>
    %c0_3 = arith.constant 0 : index
    %c0_4 = arith.constant 0 : index
    %c0_5 = arith.constant 0 : index
    %c0_6 = arith.constant 0 : index
    %5 = vector.load %arg4[%c0_3, %c0_4, %c0_5, %c0_6] : memref<1x1x8x8xf32, #tpu.memory_space<vmem>>, vector<1x1x8x8xf32>
    %6 = vector.shape_cast %5 : vector<1x1x8x8xf32> to vector<8x8xf32>
    %c0_7 = arith.constant 0 : index
    %c0_8 = arith.constant 0 : index
    %7 = vector.load %arg5[%c0_7, %c0_8] : memref<32x32xf32, #tpu.memory_space<vmem>>, vector<32x32xf32>
    %cst = arith.constant dense<0.000000e+00> : vector<8x32xf32>
    %8 = tpu.matmul %4, %7, %cst {dimension_numbers = #tpu.dot_dimension_numbers<[1], [0], [0], [1], [0, 0, 1, 1], [], []>} : vector<8x32xf32>, vector<32x32xf32>, vector<8x32xf32> -> vector<8x32xf32>
    %c0_9 = arith.constant 0 : index
    %c0_10 = arith.constant 0 : index
    %9 = vector.load %arg6[%c0_9, %c0_10] : memref<1x32xf32, #tpu.memory_space<vmem>>, vector<1x32xf32>
    %10 = vector.broadcast %9 : vector<1x32xf32> to vector<8x32xf32>
    %11 = arith.addf %8, %10 : vector<8x32xf32>
    %12 = vector.shape_cast %11 : vector<8x32xf32> to vector<8x4x8xf32>
    %13 = tpu.transpose %12, [1, 0, 2] : vector<8x4x8xf32> -> vector<4x8x8xf32>
    %c0_11 = arith.constant 0 : index
    %c0_12 = arith.constant 0 : index
    %c0_13 = arith.constant 0 : index
    %14 = vector.load %arg21[%c0_11, %c0_12, %c0_13] : memref<4x8x8xf32, #tpu.memory_space<vmem>>, vector<4x8x8xf32>
    %c0_14 = arith.constant 0 : index
    %c0_15 = arith.constant 0 : index
    %c0_16 = arith.constant 0 : index
    %15 = vector.load %arg22[%c0_14, %c0_15, %c0_16] : memref<4x8x8xf32, #tpu.memory_space<vmem>>, vector<4x8x8xf32>
    "tpu.trace_start"() <{level = 10 : i32, message = "hqd,hkd->hqk"}> : () -> ()
    %cst_17 = arith.constant dense<0.000000e+00> : vector<4x8x8xf32>
    %16 = tpu.matmul %13, %14, %cst_17 {dimension_numbers = #tpu.dot_dimension_numbers<[2], [2], [1], [1], [0, 0, 0, 1, 1, 1], [0], [0]>} : vector<4x8x8xf32>, vector<4x8x8xf32>, vector<4x8x8xf32> -> vector<4x8x8xf32>
    "tpu.trace_stop"() : () -> ()
    %cst_18 = arith.constant 0.353553385 : f32
    %17 = vector.broadcast %cst_18 : f32 to vector<4x8x8xf32>
    %18 = arith.mulf %16, %17 : vector<4x8x8xf32>
    %19 = vector.shape_cast %6 : vector<8x8xf32> to vector<1x8x8xf32>
    %20 = vector.broadcast %19 : vector<1x8x8xf32> to vector<4x8x8xf32>
    %21 = arith.addf %18, %20 : vector<4x8x8xf32>
    %cst_19 = arith.constant dense<0xFF800000> : vector<4x8xf32>
    %22 = vector.multi_reduction <maximumf>, %21, %cst_19 [2] : vector<4x8x8xf32> to vector<4x8xf32>
    %23 = vector.shape_cast %22 : vector<4x8xf32> to vector<4x8x1xf32>
    %24 = vector.broadcast %23 : vector<4x8x1xf32> to vector<4x8x8xf32>
    %25 = arith.subf %21, %24 : vector<4x8x8xf32>
    %26 = math.exp %25 : vector<4x8x8xf32>
    %cst_20 = arith.constant dense<0.000000e+00> : vector<4x8xf32>
    %27 = vector.multi_reduction <add>, %26, %cst_20 [2] : vector<4x8x8xf32> to vector<4x8xf32>
    %28 = vector.shape_cast %27 : vector<4x8xf32> to vector<4x8x1xf32>
    %29 = vector.broadcast %28 : vector<4x8x1xf32> to vector<4x8x8xf32>
    %30 = arith.divf %26, %29 : vector<4x8x8xf32>
    %c0_21 = arith.constant 0 : index
    %c0_22 = arith.constant 0 : index
    %c0_23 = arith.constant 0 : index
    %c0_24 = arith.constant 0 : index
    %31 = vector.load %arg20[%c0_21, %c0_22, %c0_23, %c0_24] : memref<1x4x8x8xf32, #tpu.memory_space<vmem>>, vector<1x4x8x8xf32>
    %32 = vector.shape_cast %31 : vector<1x4x8x8xf32> to vector<4x8x8xf32>
    %33 = vector.shape_cast %30 : vector<4x8x8xf32> to vector<1x4x8x8xf32>
    tpu.vector_store %arg20[%c0_21, %c0_22, %c0_23, %c0_24], %33 {strides = array<i32>} : memref<1x4x8x8xf32, #tpu.memory_space<vmem>>, vector<1x4x8x8xf32>,
    "tpu.trace_start"() <{level = 10 : i32, message = "hqk,hkd->hqd"}> : () -> ()
    %cst_25 = arith.constant dense<0.000000e+00> : vector<4x8x8xf32>
    %34 = tpu.matmul %30, %15, %cst_25 {dimension_numbers = #tpu.dot_dimension_numbers<[2], [1], [1], [2], [0, 0, 0, 1, 1, 2], [0], [0]>} : vector<4x8x8xf32>, vector<4x8x8xf32>, vector<4x8x8xf32> -> vector<4x8x8xf32>
    "tpu.trace_stop"() : () -> ()
    %35 = tpu.transpose %34, [1, 0, 2] : vector<4x8x8xf32> -> vector<8x4x8xf32>
    %36 = vector.shape_cast %35 : vector<8x4x8xf32> to vector<8x32xf32>
    %c0_26 = arith.constant 0 : index
    %c0_27 = arith.constant 0 : index
    %37 = vector.load %arg15[%c0_26, %c0_27] : memref<1x32xf32, #tpu.memory_space<vmem>>, vector<1x32xf32>
    %c0_28 = arith.constant 0 : index
    %c0_29 = arith.constant 0 : index
    %38 = vector.load %arg16[%c0_28, %c0_29] : memref<1x32xf32, #tpu.memory_space<vmem>>, vector<1x32xf32>
    %cst_30 = arith.constant dense<0.000000e+00> : vector<8xf32>
    %39 = vector.multi_reduction <add>, %36, %cst_30 [1] : vector<8x32xf32> to vector<8xf32>
    %40 = vector.shape_cast %39 : vector<8xf32> to vector<8x1xf32>
    %cst_31 = arith.constant 3.200000e+01 : f32
    %41 = vector.broadcast %cst_31 : f32 to vector<8x1xf32>
    %42 = arith.divf %40, %41 : vector<8x1xf32>
    %43 = arith.mulf %36, %36 : vector<8x32xf32>
    %cst_32 = arith.constant dense<0.000000e+00> : vector<8xf32>
    %44 = vector.multi_reduction <add>, %43, %cst_32 [1] : vector<8x32xf32> to vector<8xf32>
    %45 = vector.shape_cast %44 : vector<8xf32> to vector<8x1xf32>
    %cst_33 = arith.constant 3.200000e+01 : f32
    %46 = vector.broadcast %cst_33 : f32 to vector<8x1xf32>
    %47 = arith.divf %45, %46 : vector<8x1xf32>
    %48 = arith.mulf %42, %42 : vector<8x1xf32>
    %49 = arith.subf %47, %48 : vector<8x1xf32>
    %cst_34 = arith.constant 0.000000e+00 : f32
    %50 = vector.broadcast %cst_34 : f32 to vector<8x1xf32>
    %51 = arith.maximumf %49, %50 : vector<8x1xf32>
    %52 = vector.broadcast %42 : vector<8x1xf32> to vector<8x32xf32>
    %53 = arith.subf %36, %52 : vector<8x32xf32>
    %cst_35 = arith.constant 9.99999996E-13 : f32
    %54 = vector.broadcast %cst_35 : f32 to vector<8x1xf32>
    %55 = arith.addf %51, %54 : vector<8x1xf32>
    %56 = math.rsqrt %55 : vector<8x1xf32>
    %57 = vector.broadcast %56 : vector<8x1xf32> to vector<8x32xf32>
    %58 = arith.mulf %53, %57 : vector<8x32xf32>
    %59 = vector.broadcast %37 : vector<1x32xf32> to vector<8x32xf32>
    %60 = arith.mulf %59, %58 : vector<8x32xf32>
    %61 = vector.broadcast %38 : vector<1x32xf32> to vector<8x32xf32>
    %62 = arith.addf %60, %61 : vector<8x32xf32>
    %63 = arith.addf %62, %4 : vector<8x32xf32>
    %c0_36 = arith.constant 0 : index
    %c0_37 = arith.constant 0 : index
    %64 = vector.load %arg11[%c0_36, %c0_37] : memref<32x64xf32, #tpu.memory_space<vmem>>, vector<32x64xf32>
    %cst_38 = arith.constant dense<0.000000e+00> : vector<8x64xf32>
    %65 = tpu.matmul %63, %64, %cst_38 {dimension_numbers = #tpu.dot_dimension_numbers<[1], [0], [0], [1], [0, 0, 1, 1], [], []>} : vector<8x32xf32>, vector<32x64xf32>, vector<8x64xf32> -> vector<8x64xf32>
    %c0_39 = arith.constant 0 : index
    %c0_40 = arith.constant 0 : index
    %66 = vector.load %arg12[%c0_39, %c0_40] : memref<1x64xf32, #tpu.memory_space<vmem>>, vector<1x64xf32>
    %67 = vector.broadcast %66 : vector<1x64xf32> to vector<8x64xf32>
    %68 = arith.addf %65, %67 : vector<8x64xf32>
    %cst_41 = arith.constant 0.000000e+00 : f32
    %69 = vector.broadcast %cst_41 : f32 to vector<8x64xf32>
    %70 = arith.maximumf %68, %69 : vector<8x64xf32>
    %c0_42 = arith.constant 0 : index
    %c0_43 = arith.constant 0 : index
    %71 = vector.load %arg13[%c0_42, %c0_43] : memref<64x32xf32, #tpu.memory_space<vmem>>, vector<64x32xf32>
    %cst_44 = arith.constant dense<0.000000e+00> : vector<8x32xf32>
    %72 = tpu.matmul %70, %71, %cst_44 {dimension_numbers = #tpu.dot_dimension_numbers<[1], [0], [0], [1], [0, 0, 1, 1], [], []>} : vector<8x64xf32>, vector<64x32xf32>, vector<8x32xf32> -> vector<8x32xf32>
    %c0_45 = arith.constant 0 : index
    %c0_46 = arith.constant 0 : index
    %73 = vector.load %arg14[%c0_45, %c0_46] : memref<1x32xf32, #tpu.memory_space<vmem>>, vector<1x32xf32>
    %74 = vector.broadcast %73 : vector<1x32xf32> to vector<8x32xf32>
    %75 = arith.addf %72, %74 : vector<8x32xf32>
    %c0_47 = arith.constant 0 : index
    %c0_48 = arith.constant 0 : index
    %76 = vector.load %arg17[%c0_47, %c0_48] : memref<1x32xf32, #tpu.memory_space<vmem>>, vector<1x32xf32>
    %c0_49 = arith.constant 0 : index
    %c0_50 = arith.constant 0 : index
    %77 = vector.load %arg18[%c0_49, %c0_50] : memref<1x32xf32, #tpu.memory_space<vmem>>, vector<1x32xf32>
    %cst_51 = arith.constant dense<0.000000e+00> : vector<8xf32>
    %78 = vector.multi_reduction <add>, %75, %cst_51 [1] : vector<8x32xf32> to vector<8xf32>
    %79 = vector.shape_cast %78 : vector<8xf32> to vector<8x1xf32>
    %cst_52 = arith.constant 3.200000e+01 : f32
    %80 = vector.broadcast %cst_52 : f32 to vector<8x1xf32>
    %81 = arith.divf %79, %80 : vector<8x1xf32>
    %82 = arith.mulf %75, %75 : vector<8x32xf32>
    %cst_53 = arith.constant dense<0.000000e+00> : vector<8xf32>
    %83 = vector.multi_reduction <add>, %82, %cst_53 [1] : vector<8x32xf32> to vector<8xf32>
    %84 = vector.shape_cast %83 : vector<8xf32> to vector<8x1xf32>
    %cst_54 = arith.constant 3.200000e+01 : f32
    %85 = vector.broadcast %cst_54 : f32 to vector<8x1xf32>
    %86 = arith.divf %84, %85 : vector<8x1xf32>
    %87 = arith.mulf %81, %81 : vector<8x1xf32>
    %88 = arith.subf %86, %87 : vector<8x1xf32>
    %cst_55 = arith.constant 0.000000e+00 : f32
    %89 = vector.broadcast %cst_55 : f32 to vector<8x1xf32>
    %90 = arith.maximumf %88, %89 : vector<8x1xf32>
    %91 = vector.broadcast %81 : vector<8x1xf32> to vector<8x32xf32>
    %92 = arith.subf %75, %91 : vector<8x32xf32>
    %cst_56 = arith.constant 9.99999996E-13 : f32
    %93 = vector.broadcast %cst_56 : f32 to vector<8x1xf32>
    %94 = arith.addf %90, %93 : vector<8x1xf32>
    %95 = math.rsqrt %94 : vector<8x1xf32>
    %96 = vector.broadcast %95 : vector<8x1xf32> to vector<8x32xf32>
    %97 = arith.mulf %92, %96 : vector<8x32xf32>
    %98 = vector.broadcast %76 : vector<1x32xf32> to vector<8x32xf32>
    %99 = arith.mulf %98, %97 : vector<8x32xf32>
    %100 = vector.broadcast %77 : vector<1x32xf32> to vector<8x32xf32>
    %101 = arith.addf %99, %100 : vector<8x32xf32>
    %102 = arith.addf %101, %63 : vector<8x32xf32>
    %c0_57 = arith.constant 0 : index
    %c0_58 = arith.constant 0 : index
    %c0_59 = arith.constant 0 : index
    %103 = vector.load %arg19[%c0_57, %c0_58, %c0_59] : memref<1x8x32xf32, #tpu.memory_space<vmem>>, vector<1x8x32xf32>
    %104 = vector.shape_cast %103 : vector<1x8x32xf32> to vector<8x32xf32>
    %105 = vector.shape_cast %102 : vector<8x32xf32> to vector<1x8x32xf32>
    tpu.vector_store %arg19[%c0_57, %c0_58, %c0_59], %105 {strides = array<i32>} : memref<1x8x32xf32, #tpu.memory_space<vmem>>, vector<1x8x32xf32>,
    return
  }
  func.func @transform_0(%arg0: i32, %arg1: i32) -> (i32, i32, i32) {
    %c0_i32 = arith.constant 0 : i32
    %c0_i32_0 = arith.constant 0 : i32
    return %arg0, %arg1, %c0_i32 : i32, i32, i32
  }
  func.func @transform_1(%arg0: i32, %arg1: i32) -> (i32, i32, i32) {
    %c0_i32 = arith.constant 0 : i32
    %c0_i32_0 = arith.constant 0 : i32
    %c0_i32_1 = arith.constant 0 : i32
    return %arg0, %c0_i32, %c0_i32_0 : i32, i32, i32
  }
  func.func @transform_2(%arg0: i32, %arg1: i32) -> (i32, i32, i32, i32) {
    %c0_i32 = arith.constant 0 : i32
    %c0_i32_0 = arith.constant 0 : i32
    %c0_i32_1 = arith.constant 0 : i32
    return %arg0, %c0_i32, %arg1, %c0_i32_0 : i32, i32, i32, i32
  }
  func.func @transform_3(%arg0: i32, %arg1: i32) -> (i32, i32) {
    %c0_i32 = arith.constant 0 : i32
    %c0_i32_0 = arith.constant 0 : i32
    %c0_i32_1 = arith.constant 0 : i32
    return %c0_i32, %c0_i32_0 : i32, i32
  }
  func.func @transform_4(%arg0: i32, %arg1: i32) -> (i32, i32) {
    %c0_i32 = arith.constant 0 : i32
    %c0_i32_0 = arith.constant 0 : i32
    %c0_i32_1 = arith.constant 0 : i32
    return %c0_i32, %c0_i32_0 : i32, i32
  }
  func.func @transform_5(%arg0: i32, %arg1: i32) -> (i32, i32) {
    %c0_i32 = arith.constant 0 : i32
    %c0_i32_0 = arith.constant 0 : i32
    %c0_i32_1 = arith.constant 0 : i32
    return %c0_i32, %c0_i32_0 : i32, i32
  }
  func.func @transform_6(%arg0: i32, %arg1: i32) -> (i32, i32) {
    %c0_i32 = arith.constant 0 : i32
    %c0_i32_0 = arith.constant 0 : i32
    %c0_i32_1 = arith.constant 0 : i32
    return %c0_i32, %c0_i32_0 : i32, i32
  }
  func.func @transform_7(%arg0: i32, %arg1: i32) -> (i32, i32) {
    %c0_i32 = arith.constant 0 : i32
    %c0_i32_0 = arith.constant 0 : i32
    %c0_i32_1 = arith.constant 0 : i32
    return %c0_i32, %c0_i32_0 : i32, i32
  }
  func.func @transform_8(%arg0: i32, %arg1: i32) -> (i32, i32) {
    %c0_i32 = arith.constant 0 : i32
    %c0_i32_0 = arith.constant 0 : i32
    %c0_i32_1 = arith.constant 0 : i32
    return %c0_i32, %c0_i32_0 : i32, i32
  }
  func.func @transform_9(%arg0: i32, %arg1: i32) -> (i32, i32) {
    %c0_i32 = arith.constant 0 : i32
    %c0_i32_0 = arith.constant 0 : i32
    %c0_i32_1 = arith.constant 0 : i32
    return %c0_i32, %c0_i32_0 : i32, i32
  }
  func.func @transform_10(%arg0: i32, %arg1: i32) -> (i32, i32) {
    %c0_i32 = arith.constant 0 : i32
    %c0_i32_0 = arith.constant 0 : i32
    %c0_i32_1 = arith.constant 0 : i32
    return %c0_i32, %c0_i32_0 : i32, i32
  }
  func.func @transform_11(%arg0: i32, %arg1: i32) -> (i32, i32) {
    %c0_i32 = arith.constant 0 : i32
    %c0_i32_0 = arith.constant 0 : i32
    %c0_i32_1 = arith.constant 0 : i32
    return %c0_i32, %c0_i32_0 : i32, i32
  }
  func.func @transform_12(%arg0: i32, %arg1: i32) -> (i32, i32) {
    %c0_i32 = arith.constant 0 : i32
    %c0_i32_0 = arith.constant 0 : i32
    %c0_i32_1 = arith.constant 0 : i32
    return %c0_i32, %c0_i32_0 : i32, i32
  }
  func.func @transform_13(%arg0: i32, %arg1: i32) -> (i32, i32) {
    %c0_i32 = arith.constant 0 : i32
    %c0_i32_0 = arith.constant 0 : i32
    %c0_i32_1 = arith.constant 0 : i32
    return %c0_i32, %c0_i32_0 : i32, i32
  }
  func.func @transform_14(%arg0: i32, %arg1: i32) -> (i32, i32) {
    %c0_i32 = arith.constant 0 : i32
    %c0_i32_0 = arith.constant 0 : i32
    %c0_i32_1 = arith.constant 0 : i32
    return %c0_i32, %c0_i32_0 : i32, i32
  }
  func.func @transform_15(%arg0: i32, %arg1: i32) -> (i32, i32) {
    %c0_i32 = arith.constant 0 : i32
    %c0_i32_0 = arith.constant 0 : i32
    %c0_i32_1 = arith.constant 0 : i32
    return %c0_i32, %c0_i32_0 : i32, i32
  }
  func.func @transform_16(%arg0: i32, %arg1: i32) -> (i32, i32) {
    %c0_i32 = arith.constant 0 : i32
    %c0_i32_0 = arith.constant 0 : i32
    %c0_i32_1 = arith.constant 0 : i32
    return %c0_i32, %c0_i32_0 : i32, i32
  }
  func.func @transform_17(%arg0: i32, %arg1: i32) -> (i32, i32, i32) {
    %c0_i32 = arith.constant 0 : i32
    %c0_i32_0 = arith.constant 0 : i32
    return %arg0, %arg1, %c0_i32 : i32, i32, i32
  }
  func.func @transform_18(%arg0: i32, %arg1: i32) -> (i32, i32, i32, i32) {
    %c0_i32 = arith.constant 0 : i32
    %c0_i32_0 = arith.constant 0 : i32
    %c0_i32_1 = arith.constant 0 : i32
    return %arg0, %c0_i32, %arg1, %c0_i32_0 : i32, i32, i32, i32
  }
}

</mosaic_0001>

<bundles_post_ra>
// kernel: tpu_custom_call.1
= control target key start
LH: loop header
LB: loop body
LE: loop exit
PB: predicated region body
PF: predicated region fallthrough
CT: control target
= control target key end

     0   :  { %s4006_s0 = inlined_call_operand.hbm [shape: f32[2,8,32], index: 0, kind: input, shape index: {}]   ;;  %s4007_s1 = inlined_call_operand.hbm [shape: f32[2,8,32], index: 1, kind: input, shape index: {}]   ;;  %s4008_s2 = inlined_call_operand.hbm [shape: f32[2,1,8,8], index: 2, kind: input, shape index: {}]   ;;  %s4009_s3 = inlined_call_operand.vmem [shape: f32[32,32], index: 3, kind: input, shape index: {}]   ;;  %s4010_s4 = inlined_call_operand.vmem [shape: f32[1,32], index: 4, kind: input, shape index: {}]   ;;  %s4011_s5 = inlined_call_operand.vmem [shape: f32[32,32], index: 5, kind: input, shape index: {}]   ;;  %s4012_s6 = inlined_call_operand.vmem [shape: f32[1,32], index: 6, kind: input, shape index: {}]   ;;  %s4013_s7 = inlined_call_operand.vmem [shape: f32[32,32], index: 7, kind: input, shape index: {}]   ;;  %s4014_s8 = inlined_call_operand.vmem [shape: f32[1,32], index: 8, kind: input, shape index: {}]   ;;  %s4015_s9 = inlined_call_operand.hbm [shape: f32[32,64], index: 9, kind: input, shape index: {}]   ;;  %s4016_s10 = inlined_call_operand.vmem [shape: f32[1,64], index: 10, kind: input, shape index: {}]   ;;  %s4017_s11 = inlined_call_operand.vmem [shape: f32[64,32], index: 11, kind: input, shape index: {}]   ;;  %s4018_s12 = inlined_call_operand.vmem [shape: f32[1,32], index: 12, kind: input, shape index: {}]   ;;  %s4019_s13 = inlined_call_operand.vmem [shape: f32[1,32], index: 13, kind: input, shape index: {}]   ;;  %s4020_s14 = inlined_call_operand.vmem [shape: f32[1,32], index: 14, kind: input, shape index: {}]   ;;  %s4021_s15 = inlined_call_operand.vmem [shape: f32[1,32], index: 15, kind: input, shape index: {}]   ;;  %s4022_s16 = inlined_call_operand.vmem [shape: f32[1,32], index: 16, kind: input, shape index: {}]   ;;  %s4023_s17 = inlined_call_operand.hbm [shape: f32[2,8,32], index: 17, kind: output, shape index: {0}]   ;;  %s4024_s18 = inlined_call_operand.hbm [shape: f32[2,4,8,8], index: 18, kind: output, shape index: {1}]  }
   0x1   :  { %4052 = sst [smem:[#allocation28_spill]] %s4006_s0 }
   0x2   :  { %4053 = sst [smem:[#allocation29_spill]] %s4007_s1 }
   0x3   :  { %4054 = sst [smem:[#allocation30_spill]] %s4008_s2 }
   0x4   :  { %4055 = sst [smem:[#allocation31_spill]] %s4010_s4 }
   0x5   :  { %4056 = sst [smem:[#allocation32_spill]] %s4013_s7 }
   0x6   :  { %4057 = sst [smem:[#allocation33_spill]] %s4014_s8 }
   0x7   :  { %4058 = sst [smem:[#allocation34_spill]] %s4016_s10 }
   0x8   :  { %4059 = sst [smem:[#allocation35_spill]] %s4017_s11 }
   0x9   :  { %4060 = sst [smem:[#allocation36_spill]] %s4018_s12 }
   0xa   :  { %4061 = sst [smem:[#allocation37_spill]] %s4019_s13 }
   0xb   :  { %4062 = sst [smem:[#allocation38_spill]] %s4020_s14 }
   0xc   :  { %4063 = sst [smem:[#allocation39_spill]] %s4021_s15 }
   0xd   :  { %4064 = sst [smem:[#allocation40_spill]] %s4022_s16 }
   0xe   :  { %4065 = sst [smem:[#allocation41_spill]] %s4023_s17 }
   0xf   :  { %4066 = sst [smem:[#allocation42_spill]] %s4024_s18 }
  0x10   :  { %24 = vsyncpa [#allocation5], 0 }
  0x11   :  { %26 = vsyncpa [#allocation5 + $0x1], 0 }
  0x12   :  { %27 = vsyncpa [#allocation8], 0 }
  0x13   :  { %29 = vsyncpa [#allocation8 + $0x1], 0 }
  0x14   :  { %30 = vsyncpa [#allocation11], 0 }
  0x15   :  { %31 = vsyncpa [#allocation6], 0 }
  0x16   :  { %33 = vsyncpa [#allocation6 + $0x1], 0 }
  0x17   :  { %34 = vsyncpa [#allocation14], 0 }
  0x18   :  { %36 = vsyncpa [#allocation14 + $0x1], 0  ;;  %s3399_s27 = smov 0   ;;  %s3401_s28 = smov 0  }
  0x19   :  { %s3403_s29 = smov 0   ;;  %s3405_s30 = smov 0  }
  0x1a   :  { %s3407_s0 = smov 0   ;;  %s3409_s19 = smov 0  }
  0x1b LB: > { %4067 = sst [smem:[#allocation20_spill]] %s3262_s27  ;;  %s54_s1 = sadd.s32 1, %s3278_s0  ;;  %s3282_s19 = sphi %s3409_s19, %s42_s19   ;;  %s3278_s0 = sphi %s3407_s0, %s4116_s0   ;;  %s3274_s30 = sphi %s3405_s30, %s4115_s30   ;;  %s3270_s29 = sphi %s3403_s29, %s4119_s29   ;;  %s3266_s28 = sphi %s3401_s28, %s4118_s28   ;;  %s3262_s27 = sphi %s3399_s27, %s4117_s27  }
  0x1c   : > { %4068 = sst [smem:[#allocation21_spill]] %s3274_s30  ;;  %s63_s20 = sadd.s32 1, %s3270_s29 }
  0x1d   : > { %4069 = sst [smem:[#allocation22_spill]] %s3278_s0  ;;  %p56_p0 = scmp.ge.s32.totalorder %s54_s1, 2 }
  0x1e   : > { %4070 = sst [smem:[#allocation23_spill]] %s3282_s19  ;;  %p4033_p1 = scmp.ne.s32.totalorder %s3270_s29, %s3266_s28 }
  0x1f   : > { %p71_p2 = scmp.eq.s32.totalorder %s3282_s19, 0  ;;  %s4121_s1 = smov (%p56_p0, %s54_s1), 0 }
  0x20   : > { %4071 = sst [smem:[#allocation24_spill]] %s4121_s1  ;;  %p2956_p5 = scmp.lt.s32.totalorder %s3282_s19, 2 }
  0x21   : > { %p72_p4 = por %p71_p2, %p4033_p1  ;;  %s58_s21 = ssub.s32 %s3278_s0, %s4121_s1 }
  0x22   : > { %s4030_s22 = sand.u32 1, %s3270_s29   ;;  %p61_p6 = scmp.eq.s32.totalorder %s58_s21, 0 }
  0x23   : > { %s3446_s2 = sshll.u32 %s4030_s22, 3  ;;  %s3449_s23 = sshll.u32 %s3278_s0, 7 }
  0x24   : > { %p3451_p7 = pnand %p2956_p5, %p72_p4  ;;  %s575_s26 = sand.u32 1, %s3282_s19  }
  0x25   : > { %s3456_s25 = scalar_select %p61_p6, %s3270_s29, %s63_s20  }
  0x26   : > { %s4072_s24 = scalar_select %p3451_p7, 1, 0 }
  0x27   : > { %4073 = sst [smem:[#allocation25_spill]] %s3456_s25  ;;  %s579_s21 = scalar_lea.vmem [#allocation7], %s3446_s2 }
  0x28   : > { %s4074_s1 = sld [smem:[#allocation29_spill]]  ;;  %s586_s22 = sshll.u32 %s579_s21, 4  ;;  %s3466_s22 = int_to_ptr.vmem [resolvable:$true] %s586_s22 }
  0x29   : > { %s3468_s0 = scalar_lea.sflag [#allocation8], %s575_s26  ;;  %p3474_p9 = pneg %p3451_p7 }
  0x2b   : > { %s4075_s20 = scalar_select %p3474_p9, 1, 0 }
  0x2e   : > { %s3463_s15 = scalar_lea.hbm %s4074_s1, %s3449_s23  ;;  %s3047_s25 = scalar_lea.hbm %s4074_s1, 256 }
  0x2f   : > { %s3042_s18 = scalar_lea.hbm %s3463_s15, 128  ;;  %p3048_p12 = scmp.lt.u32.totalorder %s3463_s15, %s4074_s1 }
  0x30   : > { %p3043_p8 = scmp.ne.s32.totalorder %s3463_s15, %s3042_s18  ;;  %p3049_p13 = scmp.lt.u32.totalorder %s3047_s25, %s3042_s18 }
  0x31   : > { %p3051_p2 = scmp.lt.u32.totalorder %s3042_s18, %s3463_s15 }
  0x32   : > { %p3045_p10 = pnand %p3474_p9, %p3043_p8  ;;  %p3050_p0 = por %p3049_p13, %p3048_p12 }
  0x34   : > { %p3046_p11 = pneg %p3045_p10  ;;  %p3052_p4 = por %p3051_p2, %p3050_p0 }
  0x36   : > { %p3053_p5 = pnand %p3052_p4, %p3046_p11 }
  0x38   : > { %3056 = shalt.err (!%p3053_p5)
}
  0x39   : > { %s3057_s26 = scalar_lea.vmem %s3466_s22, 128  ;;  %s3284_s16 = smov [#allocation7]  }
  0x3a   : > { %p3058_p6 = scmp.ne.s32.totalorder %s3466_s22, %s3057_s26  ;;  %s3062_s17 = sshll.u32 %s3284_s16, 4  ;;  %s3063_s17 = int_to_ptr.vmem [resolvable:$false] %s3062_s17 }
  0x3b   : > { %s3064_s12 = scalar_lea.vmem %s3063_s17, 256  ;;  %p3065_p3 = scmp.lt.s32.totalorder %s3466_s22, %s3063_s17 }
  0x3c   : > { %p3060_p8 = pnand %p3058_p6, %p3474_p9  ;;  %p3066_p1 = scmp.lt.s32.totalorder %s3064_s12, %s3057_s26 }
  0x3e   : > { %p3061_p10 = pneg %p3060_p8  ;;  %p3067_p12 = por %p3066_p1, %p3065_p3 }
  0x40   : > { %p3068_p13 = pnand %p3067_p12, %p3061_p10 }
  0x42   : > { %3071 = shalt.err (!%p3068_p13)
}
  0x43   : > { %2944 = dma.hbm_to_vmem [thread:$0]  (!%p3451_p7), %s3463_s15, 128, %s3466_s22, %s3468_s0  }
  0x44   : > { %s3499_s18 = sadd.s32 4294967295, %s3282_s19   ;;  %s2677_s25 = sadd.s32 4294967294, %s3282_s19  }
  0x45   : > { %p76_p1 = scmp.ne.s32.totalorder %s3266_s28, %s3262_s27  ;;  %p4042_p3 = scmp.eq.s32.totalorder %s3499_s18, 0 }
  0x46   : > { %p450_p11 = scmp.eq.s32.totalorder %s3499_s18, 1  ;;  %p456_p0 = scmp.eq.s32.totalorder %s2677_s25, 1 }
  0x47   : > { %p2678_p2 = scmp.ge.s32.totalorder %s3282_s19, 1  ;;  %p3509_p4 = por %p4042_p3, %p76_p1 }
  0x48   : > { %p4077_p5 = scmp.ne.s32.totalorder %s3270_s29, %s3266_s28  ;;  %p3520_p8 = por %p456_p0, %p76_p1 }
  0x49   : > { %s4076_s21 = scalar_select %p3509_p4, 1, 0 }
  0x4a   : > { %p3516_p6 = por %p450_p11, %p4077_p5  ;;  %p491_p10 = scmp.lt.s32.totalorder %s3282_s19, 3 }
  0x4b   : > { %s4080_s22 = scalar_select %p3520_p8, 1, 0 }
  0x4c   : > { %s4078_s15 = scalar_select %p3516_p6, 1, 0 }
  0x4d   : > { %4081 = sst [smem:[#allocation27_spill]] %s4080_s22  ;;  %p3525_p12 = pnand %p2678_p2, %p491_p10 }
  0x4e   : > { %4079 = sst [smem:[#allocation26_spill]] %s4078_s15  ;;  %s3285_s16 = smov [#allocation10]  }
  0x4f   : > { %s4082_s26 = scalar_select %p3525_p12, 1, 0 }
  0x50   : > { %s521_s17 = sshll.u32 %s3285_s16, 4  ;;  %p2934_p13 = pneg %p3525_p12  ;;  %s3529_s17 = int_to_ptr.vmem [resolvable:$true] %s521_s17 }
  0x51   : > { %s4084_s22 = sld [smem:[#allocation28_spill]]  ;;  %s560_s27 = scalar_lea.vmem [#allocation4], %s3446_s2 }
  0x52   : > { %p3535_p11 = pnand %p2934_p13, %p4042_p3  ;;  %s568_s15 = sshll.u32 %s560_s27, 4  ;;  %s3546_s15 = int_to_ptr.vmem [resolvable:$true] %s568_s15 }
  0x53   : > { %s3072_s10 = scalar_lea.hbm %s4015_s9, 512 }
  0x54   : > { %p3073_p1 = scmp.ne.s32.totalorder %s4015_s9, %s3072_s10  ;;  %p3074_p0 = pneg %p3535_p11 }
  0x55   : > { %p3079_p10 = scmp.lt.u32.totalorder %s3072_s10, %s4015_s9 }
  0x56   : > { %p3075_p2 = pnand %p3074_p0, %p3073_p1 }
  0x57   : > { %s3543_s19 = scalar_lea.hbm %s4084_s22, %s3449_s23 }
  0x58   : > { %p3076_p5 = pneg %p3075_p2 }
  0x5a   : > { %p3081_p13 = pnand %p3079_p10, %p3076_p5 }
  0x5c   : > { %3084 = shalt.err (!%p3081_p13)
}
  0x5d   : > { %s3085_s27 = scalar_lea.vmem %s3529_s17, 512  ;;  %p3093_p4 = scmp.lt.s32.totalorder %s3529_s17, %s3529_s17 }
  0x5e   : > { %p3086_p3 = scmp.ne.s32.totalorder %s3529_s17, %s3085_s27  ;;  %p3094_p12 = scmp.lt.s32.totalorder %s3085_s27, %s3085_s27 }
  0x60   : > { %p3088_p8 = pnand %p3086_p3, %p3074_p0  ;;  %p3095_p7 = por %p3094_p12, %p3093_p4 }
  0x62   : > { %p3089_p6 = pneg %p3088_p8 }
  0x64   : > { %p3096_p9 = pnand %p3095_p7, %p3089_p6 }
  0x66   : > { %3099 = shalt.err (!%p3096_p9)
}
  0x67   : > { %s3286_s13 = smov 128   ;;  %s3287_s10 = smov 8  }
  0x68   : > { %2937 = dma.hbm_to_vmem [thread:$0]  (!%p3535_p11), %s4015_s9, 512, %s3529_s17, [#allocation11], %s3286_s13, %s3286_s13, %s3287_s10  }
  0x69   : > { %s4085_s16 = sand.u32 1, %s3270_s29   ;;  %s3100_s25 = scalar_lea.hbm %s3543_s19, 128 }
  0x6a   : > { %s557_s1 = scalar_lea.sflag [#allocation5], %s4085_s16  ;;  %p3101_p7 = scmp.ne.s32.totalorder %s3543_s19, %s3100_s25 }
  0x6b   : > { %p4086_p9 = scmp.ne.s32.totalorder %s4075_s20, 0  ;;  %s3105_s8 = scalar_lea.hbm %s4084_s22, 256 }
  0x6c   : > { %p3106_p6 = scmp.lt.u32.totalorder %s3543_s19, %s4084_s22  ;;  %p3107_p8 = scmp.lt.u32.totalorder %s3105_s8, %s3100_s25 }
  0x6d   : > { %p3103_p3 = pnand %p3101_p7, %p4086_p9  ;;  %p3109_p1 = scmp.lt.u32.totalorder %s3100_s25, %s3543_s19 }
  0x6e   : > { %p3108_p12 = por %p3107_p8, %p3106_p6 }
  0x6f   : > { %p3104_p4 = pneg %p3103_p3 }
  0x70   : > { %p3110_p0 = por %p3109_p1, %p3108_p12 }
  0x72   : > { %p3111_p11 = pnand %p3110_p0, %p3104_p4 }
  0x74   : > { %3114 = shalt.err (!%p3111_p11)
}
  0x75   : > { %s3115_s17 = scalar_lea.vmem %s3546_s15, 128  ;;  %s3288_s11 = smov [#allocation4]  }
  0x76   : > { %p3116_p2 = scmp.ne.s32.totalorder %s3546_s15, %s3115_s17  ;;  %s3120_s12 = sshll.u32 %s3288_s11, 4  ;;  %s3121_s12 = int_to_ptr.vmem [resolvable:$false] %s3120_s12 }
  0x77   : > { %s3122_s4 = scalar_lea.vmem %s3121_s12, 256  ;;  %p3123_p13 = scmp.lt.s32.totalorder %s3546_s15, %s3121_s12 }
  0x78   : > { %p3118_p5 = pnand %p3116_p2, %p4086_p9  ;;  %p3124_p7 = scmp.lt.s32.totalorder %s3122_s4, %s3115_s17 }
  0x7a   : > { %p3119_p10 = pneg %p3118_p5  ;;  %p3125_p3 = por %p3124_p7, %p3123_p13 }
  0x7c   : > { %p3126_p6 = pnand %p3125_p3, %p3119_p10 }
  0x7e   : > { %3129 = shalt.err (!%p3126_p6)
}
  0x7f   : > { %p4087_p4 = scmp.ne.s32.totalorder %s4072_s24, 0  ;;  %s4088_s13 = sld [smem:[#allocation30_spill]] }
  0x80   : > { %s597_s14 = scalar_lea.vmem [#allocation9], %s3446_s2 }
  0x81   : > { %2941 = dma.hbm_to_vmem [thread:$0]  (!%p4087_p4), %s3543_s19, 128, %s3546_s15, %s557_s1  }
  0x82   : > { %s605_s30 = sshll.u32 %s597_s14, 4  ;;  %s606_s30 = int_to_ptr.vmem [resolvable:$true] %s605_s30 }
  0x85   : > { %s3596_s10 = scalar_lea.hbm %s4088_s13, %s3449_s23  ;;  %s3135_s19 = scalar_lea.hbm %s4088_s13, 256 }
  0x86   : > { %s3130_s16 = scalar_lea.hbm %s3596_s10, 128  ;;  %p3136_p0 = scmp.lt.u32.totalorder %s3596_s10, %s4088_s13 }
  0x87   : > { %p3131_p8 = scmp.ne.s32.totalorder %s3596_s10, %s3130_s16  ;;  %p3137_p11 = scmp.lt.u32.totalorder %s3135_s19, %s3130_s16 }
  0x88   : > { %p3139_p5 = scmp.lt.u32.totalorder %s3130_s16, %s3596_s10 }
  0x89   : > { %p3133_p12 = pnand %p3131_p8, %p4086_p9  ;;  %p3138_p2 = por %p3137_p11, %p3136_p0 }
  0x8b   : > { %p3134_p1 = pneg %p3133_p12  ;;  %p3140_p10 = por %p3139_p5, %p3138_p2 }
  0x8d   : > { %p3141_p13 = pnand %p3140_p10, %p3134_p1 }
  0x8f   : > { %3144 = shalt.err (!%p3141_p13)
}
  0x90   : > { %s3145_s2 = scalar_lea.vmem %s606_s30, 128  ;;  %s3289_s23 = smov [#allocation9]  }
  0x91   : > { %p3146_p7 = scmp.ne.s32.totalorder %s606_s30, %s3145_s2  ;;  %s3150_s17 = sshll.u32 %s3289_s23, 4  ;;  %s3151_s17 = int_to_ptr.vmem [resolvable:$false] %s3150_s17 }
  0x92   : > { %s3152_s11 = scalar_lea.vmem %s3151_s17, 256  ;;  %p3153_p8 = scmp.lt.s32.totalorder %s606_s30, %s3151_s17 }
  0x93   : > { %p3148_p3 = pnand %p3146_p7, %p4086_p9  ;;  %p3154_p12 = scmp.lt.s32.totalorder %s3152_s11, %s3145_s2 }
  0x95   : > { %p3149_p6 = pneg %p3148_p3  ;;  %p3155_p4 = por %p3154_p12, %p3153_p8 }
  0x97   : > { %p3156_p0 = pnand %p3155_p4, %p3149_p6 }
  0x99   : > { %3159 = shalt.err (!%p3156_p0)
}
  0x9a   : > { %p4089_p11 = scmp.ne.s32.totalorder %s4072_s24, 0  ;;  %p4090_p1 = scmp.ne.s32.totalorder %s4082_s26, 0 }
  0x9b   : > { %s3620_s20 = sand.u32 (!%p4090_p1), 1, %s3266_s28   ;;  %p4091_p9 = scmp.ne.s32.totalorder (!%p4090_p1), %s4076_s21, 0 }
  0x9c   : > { %2947 = dma.hbm_to_vmem [thread:$0]  (!%p4089_p11), %s3596_s10, 128, %s606_s30, %s3468_s0  }
  0x9d   : > { %614 = sbr.rel (%p4090_p1) target bundleno = 2222 (0x8ae), region = 88  ;;  %s3623_s12 = sshll.u32 (!%p4090_p1), %s3620_s20, 3 }
  0x9e   : > { %s617_s4 = scalar_lea.sflag (!%p4090_p1), [#allocation5], %s3620_s20  ;;  %s620_s7 = scalar_lea.vmem (!%p4090_p1), [#allocation4], %s3623_s12 }
  0xa4   : > { %3241 = dma.done.wait (%p4091_p9), %s617_s4, 128  }
  0xa5   : > { %3243 = vsyncadd (%p4091_p9), %s617_s4, 4294967168  ;;  %s625_s0 = sand.u32 1, %s3499_s18   ;;  %s629_s26 = scalar_lea.vmem [#allocation7], %s3623_s12 }
  0xa6   : > { %s626_s24 = scalar_lea.sflag [#allocation8], %s625_s0 }
  0xa7   : > { %3245 = dma.done.wait (%p4091_p9), %s626_s24, 256  }
  0xa8   : > { %3247 = vsyncadd (%p4091_p9), %s626_s24, 4294967040  ;;  %s638_s8 = scalar_lea.vmem [#allocation9], %s3623_s12  ;;  %p4092_p4 = scmp.eq.s32.totalorder %s3499_s18, 0 }
  0xaa   : > { %3249 = dma.done.wait (%p4092_p4), [#allocation11], 512   ;;  %p4093_p2 = pmov %p4092_p4 }
  0xab   : > { %v3290_v0 = vmov 0.0|0.0   ;;  %vm3291_vm0 = vmmov 0   ;;  %v3292_v1 = vmov 0.0   ;;  %v715_v2 = vld [vmem:[%s4011_s5] sm:$0xff]  ;;  %v716_v3 = vld [vmem:[%s4011_s5 + $0x8] sm:$0xff]  ;;  %v717_v4 = vld [vmem:[%s4011_s5 + $0x10] sm:$0xff]  ;;  %v896_v32 = vlaneseq }
  0xac   : > { %3251 = vsyncadd (%p4093_p2), [#allocation11], 4294966784  ;;  %2884 = vmatprep.subr.bf16.mxu0 %v3290_v0  ;;  %2789 = vmatprep.mubr.msk.f32.mxu0 %vm3291_vm0, %v3292_v1  ;;  %v2885_v5 = vpack.c.bf16 %v716_v3, %v715_v2  ;;  %v718_v6 = vld [vmem:[%s4011_s5 + $0x18] sm:$0xff]  ;;  %v1184_v8 = vld [vmem:[%s4009_s3] sm:$0xff]  ;;  %vm726_vm1 = vcmask 261120   ;;  %s4094_s14 = sld [smem:[#allocation32_spill]] }
  0xad   : > { %2890 = vmatprep.subr.bf16.mxu1 %v3290_v0  ;;  %2800 = vmatprep.mubr.msk.f32.mxu1 %vm3291_vm0, %v3292_v1  ;;  %v2888_v7 = vpack.c.bf16 %v718_v6, %v717_v4  ;;  %v1185_v9 = vld [vmem:[%s4009_s3 + $0x8] sm:$0xff]  ;;  %v714_v10 = vld [vmem:[%s629_s26] sm:$0xff]  ;;  %v2694_v16 = vld [vmem:[%s4012_s6] ss:$0 sm:$0xff]  ;;  %s3293_s26 = smov 104   ;;  %s4095_s27 = sld [smem:[#allocation31_spill]] }
  0xae   : > { %2886 = vmatpush3.bf16.msra.mxu0 %v2885_v5  ;;  %v2897_v11 = vpack.c.bf16 %v1185_v9, %v1184_v8  ;;  %v1186_v12 = vld [vmem:[%s4009_s3 + $0x10] sm:$0xff]  ;;  %v1187_v13 = vld [vmem:[%s4009_s3 + $0x18] sm:$0xff]  ;;  %v3680_v15 = vld [vmem:[%s620_s7] sm:$0xff]  ;;  %s3294_s7 = smov 120   ;;  %s3295_s19 = smov 112   ;;  %v897_v36 = vshrl.u32 %v896_v32, 7 }
  0xaf   : > { %2887 = vmatprep.subr.bf16.mxu0 %v3290_v0  ;;  %v2900_v14 = vpack.c.bf16 %v1187_v13, %v1186_v12  ;;  %v3296_v30 = vmov 1983009808   ;;  %v3297_v33 = vmov 1934713408   ;;  %vm1027_vm2 = vcmask 64512   ;;  %s4096_s11 = sld [smem:[#allocation33_spill]] }
  0xb0   : > { %v894_v31 = vunpack.c.l.s4 %v3296_v30  ;;  %v926_v34 = vunpack.c.l.s4 %v3297_v33  ;;  %s2693_s4 = sshll.u32 %s3620_s20, 5  ;;  %s3298_s24 = smov 16   ;;  %vm2225_vm3 = vcmask 130048   ;;  %vm2227_vm4 = vcmask 195584  }
  0xb1   : > { %s3819_s0 = scalar_lea.vmem [#allocation13], %s2693_s4  ;;  %s4097_s18 = sld [smem:[#allocation35_spill]]  ;;  %vm2363_vm5 = vcmask 523264  }
  0xb2   : > { %2889 = vmatpush3.bf16.msra.mxu0 %v2888_v7  ;;  %v800_v20 = vld [vmem:[%s4094_s14] sm:$0xff]  ;;  %v801_v21 = vld [vmem:[%s4094_s14 + $0x8] sm:$0xff]  ;;  %v802_v27 = vld [vmem:[%s4094_s14 + $0x10] sm:$0xff]  ;;  %v895_v35 = vunpack.c.0.s8 %v894_v31  ;;  %v927_v39 = vunpack.c.0.s8 %v926_v34  ;;  %s4098_s4 = sld [smem:[#allocation37_spill]]  ;;  %s4099_s21 = sld [smem:[#allocation38_spill]] }
  0xb3   : > { %2896 = vmatprep.subr.bf16.mxu0 %v3290_v0  ;;  %v2702_v22 = vld [vmem:[%s4095_s27] ss:$0 sm:$0xff]  ;;  %v2891_v23 = vpack.c.bf16 %v801_v21, %v800_v20  ;;  %v803_v28 = vld [vmem:[%s4094_s14 + $0x18] sm:$0xff]  ;;  %s4100_s15 = sld [smem:[#allocation34_spill]]  ;;  %s4101_s1 = sld [smem:[#allocation21_spill]] }
  0xb4   : > { %v2894_v29 = vpack.c.bf16 %v803_v28, %v802_v27  ;;  %v3716_v40 = vsub.s32 %v895_v35, %v897_v36  ;;  %v3718_v46 = vsub.s32 %v927_v39, %v897_v36  ;;  %s4103_s17 = sld [smem:[#allocation26_spill]]  ;;  %s2477_s30 = scalar_lea.sflag [#allocation14], %s3620_s20 }
  0xb5   : > { %2790 = vmatmul.mubr.msk.f32.vlgmr.msra.gmra.mrb[0].mxu0 %vm726_vm1, %v714_v10  ;;  %2892 = vmatpush3.bf16.msra.mxu1 %v2891_v23  ;;  %s3301_s25 = smov [#allocation13]  }
  0xb6   : > { %2898 = vmatpush3.bf16.msra.mxu0 %v2897_v11  ;;  %2811 = vmatprep.mubr.msk.f32.mxu0 %vm3291_vm0, %v3292_v1  ;;  %s3164_s27 = sshll.u32 %s3301_s25, 4  ;;  %s3165_s27 = int_to_ptr.vmem [resolvable:$false] %s3164_s27 }
  0xb7   : > { %2899 = vmatprep.subr.bf16.mxu0 %v3290_v0  ;;  %2893 = vmatprep.subr.bf16.mxu1 %v3290_v0 }
  0xb9   : > { %2895 = vmatpush3.bf16.msra.mxu1 %v2894_v29 }
  0xba   : > { %2901 = vmatpush3.bf16.msra.mxu0 %v2900_v14  ;;  %2819 = vmatprep.subr.mxu1 %v3292_v1  ;;  %p4105_p10 = scmp.ne.s32.totalorder %s4103_s17, 0 }
  0xbb   : > { %2814 = vmatprep.subr.mxu0 %v3292_v1 }
  0xbc   : > { %2801 = vmatmul.mubr.msk.f32.vlgmr.msra.gmra.mrb[0].mxu1 %vm726_vm1, %v714_v10 }
  0xbd   : > { %2812 = vmatmul.mubr.msk.f32.vlgmr.msra.gmra.mrb[2].mxu0 %vm726_vm1, %v3680_v15  ;;  %2821 = vmatprep.mubr.msk.f32.mxu1 %vm3291_vm0, %v3292_v1 }
  0xbe   : > { %2816 = vmatprep.mubr.msk.f32.mxu0 %vm3291_vm0, %v3292_v1 }
 0x188   : > { %v796_v17 = vpop.f32.mrb[0].mxu0 }
 0x189   : > { %v797_v18 = vadd.f32 %v2694_v16, %v796_v17  ;;  %v2791_v19 = vpop.f32.mrb[1].mxu0 }
 0x18b   : > { %888 = vrot.lane.b32.xlu1 %v797_v18, %s3293_s26  ;;  %882 = vrot.lane.b32.xlu0 %v797_v18, %s3294_s7 }
 0x18f   : > { %885 = vrot.lane.b32.xlu0 %v797_v18, %s3295_s19 }
 0x190   : > { %v1265_v24 = vpop.f32.mrb[2].mxu0 }
 0x191   : > { %v1266_v25 = vadd.f32 %v2702_v22, %v1265_v24  ;;  %v2813_v26 = vpop.f32.mrb[3].mxu0 }
 0x193   : > { %1273 = vrot.lane.b32.xlu0 %v1266_v25, %s3295_s19  ;;  %1270 = vrot.lane.b32.xlu1 %v1266_v25, %s3294_s7 }
 0x197   : > { %1276 = vrot.lane.b32.xlu1 %v1266_v25, %s3293_s26 }
 0x1fd   : > { %v889_v37 = vpop.permute.xlu1 %888  ;;  %v883_v38 = vpop.permute.xlu0 %882 }
 0x1fe   : > { %v907_v41 = vcombine.low %v883_v38, %v889_v37  ;;  %v908_v42 = vcombine.high %v883_v38, %v889_v37 }
 0x200   : > { %v915_v47 = vrot.slane %v907_v41, %v3716_v40  ;;  %v922_v48 = vrot.slane %v908_v42, %v3716_v40 }
 0x201   : > { %v886_v43 = vpop.permute.xlu0 %885 }
 0x202   : > { %v891_v44 = vcombine.low %v797_v18, %v886_v43  ;;  %v892_v45 = vcombine.high %v797_v18, %v886_v43 }
 0x204   : > { %v899_v49 = vrot.slane %v891_v44, %v3716_v40  ;;  %v906_v50 = vrot.slane %v892_v45, %v3716_v40 }
 0x205   : > { %v1271_v51 = vpop.permute.xlu1 %1270  ;;  %v1274_v56 = vpop.permute.xlu0 %1273 }
 0x206   : > { %v923_v52 = vcombine.low %v899_v49, %v915_v47  ;;  %v924_v53 = vcombine.high %v899_v49, %v915_v47  ;;  %v939_v54 = vcombine.low %v906_v50, %v922_v48  ;;  %v940_v55 = vcombine.high %v906_v50, %v922_v48 }
 0x207   : > { %v1279_v61 = vcombine.low %v1266_v25, %v1274_v56  ;;  %v1280_v62 = vcombine.high %v1266_v25, %v1274_v56 }
 0x208   : > { %v931_v57 = vrot.slane %v923_v52, %v3718_v46  ;;  %v938_v58 = vrot.slane %v924_v53, %v3718_v46  ;;  %v947_v59 = vrot.slane %v939_v54, %v3718_v46  ;;  %v954_v60 = vrot.slane %v940_v55, %v3718_v46 }
 0x209   : > { %v1277_v63 = vpop.permute.xlu1 %1276  ;;  %v1287_v12 = vrot.slane %v1279_v61, %v3716_v40  ;;  %v1294_v13 = vrot.slane %v1280_v62, %v3716_v40 }
 0x20a   : > { %v959_v2 = vcombine.low %v931_v57, %v938_v58  ;;  %v2698_v3 = vcombine.high %v931_v57, %v938_v58  ;;  %v975_v4 = vcombine.low %v947_v59, %v954_v60  ;;  %v2699_v5 = vcombine.high %v947_v59, %v954_v60 }
 0x20b   : > { %v1295_v6 = vcombine.low %v1271_v51, %v1277_v63  ;;  %v1296_v7 = vcombine.high %v1271_v51, %v1277_v63  ;;  %v877_v63 = vpop.f32.mrb[0].mxu1 }
 0x20c   : > { %v966_v8 = vrot.slane %v959_v2, %v3716_v40  ;;  %v974_v9 = vrot.slane %v2698_v3, %v3716_v40  ;;  %v982_v10 = vrot.slane %v975_v4, %v3716_v40  ;;  %v990_v11 = vrot.slane %v2699_v5, %v3716_v40  ;;  %v2802_v2 = vpop.f32.mrb[1].mxu1  ;;  %v1183_v5 = vld [vmem:[%s638_s8] sm:$0xff]  ;;  %s4102_s8 = sld [smem:[#allocation36_spill]] }
 0x20d   : > { %v1303_v14 = vrot.slane %v1295_v6, %v3716_v40  ;;  %v1310_v16 = vrot.slane %v1296_v7, %v3716_v40 }
 0x20e   : > { %v991_v17 = vcombine.low %v966_v8, %v974_v9  ;;  %v992_v18 = vcombine.high %v966_v8, %v974_v9  ;;  %v1007_v19 = vcombine.low %v982_v10, %v990_v11  ;;  %v1008_v20 = vcombine.high %v982_v10, %v990_v11 }
 0x20f   : > { %v1311_v21 = vcombine.low %v1287_v12, %v1303_v14  ;;  %v1312_v22 = vcombine.high %v1287_v12, %v1303_v14  ;;  %v1327_v23 = vcombine.low %v1294_v13, %v1310_v16  ;;  %v1328_v24 = vcombine.high %v1294_v13, %v1310_v16 }
 0x210   : > { %v999_v25 = vrot.slane %v991_v17, %v3718_v46  ;;  %v1006_v26 = vrot.slane %v992_v18, %v3718_v46  ;;  %v1015_v27 = vrot.slane %v1007_v19, %v3718_v46  ;;  %v1022_v28 = vrot.slane %v1008_v20, %v3718_v46 }
 0x211   : > { %v1319_v29 = vrot.slane %v1311_v21, %v3718_v46  ;;  %v1326_v30 = vrot.slane %v1312_v22, %v3718_v46  ;;  %v1335_v31 = vrot.slane %v1327_v23, %v3718_v46  ;;  %v1342_v32 = vrot.slane %v1328_v24, %v3718_v46 }
 0x212   : > { %v1023_v33 = vcombine.low %v999_v25, %v1015_v27  ;;  %v1024_v34 = vcombine.high %v999_v25, %v1015_v27  ;;  %v1025_v35 = vcombine.low %v1006_v26, %v1022_v28  ;;  %v1026_v36 = vcombine.high %v1006_v26, %v1022_v28  ;;  %v2696_v25 = vld [vmem:[%s4096_s11] ss:$0 sm:$0xff]  ;;  %s2735_s11 = sshll.u32 %s4101_s1, 9 }
 0x213   : > { %v1347_v37 = vcombine.low %v1319_v29, %v1326_v30  ;;  %v2704_v38 = vcombine.high %v1319_v29, %v1326_v30  ;;  %v1363_v39 = vcombine.low %v1335_v31, %v1342_v32  ;;  %v2705_v41 = vcombine.high %v1335_v31, %v1342_v32 }
 0x214   : > { %1028 = vst.msk [vmem:[#allocation2] sm:$0xff] %vm1027_vm2, %v1023_v33  ;;  %1029 = vst.msk [vmem:[#allocation2 + $0x8] sm:$0xff] %vm1027_vm2, %v1024_v34  ;;  %v878_v26 = vadd.f32 %v2696_v25, %v877_v63 }
 0x215   : > { %1030 = vst.msk [vmem:[#allocation2 + $0x10] sm:$0xff] %vm1027_vm2, %v1025_v35  ;;  %1031 = vst.msk [vmem:[#allocation2 + $0x18] sm:$0xff] %vm1027_vm2, %v1026_v36  ;;  %v1354_v42 = vrot.slane %v1347_v37, %v3716_v40  ;;  %v1362_v43 = vrot.slane %v2704_v38, %v3716_v40  ;;  %v1370_v44 = vrot.slane %v1363_v39, %v3716_v40 }
 0x216   : > { %v1378_v45 = vrot.slane %v2705_v41, %v3716_v40 }
 0x217   : > { %v1379_v47 = vcombine.low %v1354_v42, %v1362_v43  ;;  %v1380_v49 = vcombine.high %v1354_v42, %v1362_v43 }
 0x218   : > { %v1395_v48 = vcombine.low %v1370_v44, %v1378_v45  ;;  %v1396_v50 = vcombine.high %v1370_v44, %v1378_v45 }
 0x219   : > { %v1387_v51 = vrot.slane %v1379_v47, %v3718_v46  ;;  %v1394_v55 = vrot.slane %v1380_v49, %v3718_v46 }
 0x21a   : > { %v1403_v52 = vrot.slane %v1395_v48, %v3718_v46  ;;  %v1410_v58 = vrot.slane %v1396_v50, %v3718_v46 }
 0x21b   : > { %v1415_v53 = vld [vmem:[#allocation2] sm:$0xff]  ;;  %v1416_v54 = vld [vmem:[#allocation2 + $0x8] sm:$0xff] }
 0x21c   : > { %2815 = vmatpush3.xpose.msk.msra.mxu0 %vm1027_vm2, %v1415_v53  ;;  %2820 = vmatpush3.xpose.msk.msra.mxu1 %vm1027_vm2, %v1416_v54  ;;  %v1411_v56 = vcombine.low %v1387_v51, %v1403_v52  ;;  %v1412_v57 = vcombine.high %v1387_v51, %v1403_v52  ;;  %v1417_v59 = vld [vmem:[#allocation2 + $0x10] sm:$0xff]  ;;  %v1418_v60 = vld [vmem:[#allocation2 + $0x18] sm:$0xff]  ;;  %v1413_v61 = vcombine.low %v1394_v55, %v1410_v58 }
 0x21d   : > { %2824 = vmatprep.subr.mxu0 %v3292_v1  ;;  %2829 = vmatprep.subr.mxu1 %v3292_v1  ;;  %v1414_v62 = vcombine.high %v1394_v55, %v1410_v58 }
 0x21f   : > { %2817 = vmatmul.mubr.msk.f32.vlgmr.msra.gmra.mrb[4].mxu0 %vm1027_vm2, %v1411_v56  ;;  %2822 = vmatmul.mubr.msk.f32.vlgmr.msra.gmra.mrb[2].mxu1 %vm1027_vm2, %v1412_v57 }
 0x220   : > { %2825 = vmatpush3.xpose.msk.msra.mxu0 %vm1027_vm2, %v1417_v59  ;;  %2830 = vmatpush3.xpose.msk.msra.mxu1 %vm1027_vm2, %v1418_v60 }
 0x221   : > { %2826 = vmatprep.mubr.msk.f32.mxu0 %vm3291_vm0, %v3292_v1  ;;  %2831 = vmatprep.mubr.msk.f32.mxu1 %vm3291_vm0, %v3292_v1 }
 0x222   : > { %2834 = vmatprep.subr.mxu0 %v3292_v1  ;;  %2839 = vmatprep.subr.mxu1 %v3292_v1 }
 0x223   : > { %2827 = vmatmul.mubr.msk.f32.vlgmr.msra.gmra.mrb[6].mxu0 %vm1027_vm2, %v1413_v61  ;;  %2832 = vmatmul.mubr.msk.f32.vlgmr.msra.gmra.mrb[4].mxu1 %vm1027_vm2, %v1414_v62 }
 0x224   : > { %2836 = vmatprep.mubr.msk.f32.mxu0 %vm3291_vm0, %v3292_v1  ;;  %2841 = vmatprep.mubr.msk.f32.mxu1 %vm3291_vm0, %v3292_v1 }
 0x2f2   : > { %v1496_v3 = vpop.f32.mrb[4].mxu0  ;;  %v1572_v4 = vpop.f32.mrb[2].mxu1 }
 0x2f3   : > { %v1728_v6 = vmul.f32 0.35355338, %v1496_v3  ;;  %v1729_v7 = vmul.f32 0.35355338, %v1572_v4  ;;  %v2818_v8 = vpop.f32.mrb[5].mxu0  ;;  %v2823_v9 = vpop.f32.mrb[3].mxu1 }
 0x2f5   : > { %v1733_v10 = vadd.f32 %v1729_v7, %v1183_v5  ;;  %v1732_v11 = vadd.f32 %v1728_v6, %v1183_v5 }
 0x2f6   : > { %v1648_v12 = vpop.f32.mrb[6].mxu0  ;;  %v1724_v13 = vpop.f32.mrb[4].mxu1 }
 0x2f7   : > { %v1730_v14 = vmul.f32 0.35355338, %v1648_v12  ;;  %v2828_v16 = vpop.f32.mrb[7].mxu0  ;;  %v2833_v17 = vpop.f32.mrb[5].mxu1  ;;  %v1731_v18 = vmul.f32 0.35355338, %v1724_v13 }
 0x2f8   : > { %v1739_v19 = vsel %vm1027_vm2, %v1733_v10, -inf  ;;  %v1736_v20 = vsel %vm1027_vm2, %v1732_v11, -inf }
 0x2f9   : > { %1740 = vmax.xlane.f32.xlu1 %v1739_v19  ;;  %1737 = vmax.xlane.f32.xlu0 %v1736_v20  ;;  %v1734_v21 = vadd.f32 %v1730_v14, %v1183_v5  ;;  %v1735_v23 = vadd.f32 %v1731_v18, %v1183_v5 }
 0x2fb   : > { %v1742_v22 = vsel %vm1027_vm2, %v1734_v21, -inf  ;;  %v1745_v24 = vsel %vm1027_vm2, %v1735_v23, -inf }
 0x2fd   : > { %1743 = vmax.xlane.f32.xlu0 %v1742_v22 }
 0x301   : > { %1746 = vmax.xlane.f32.xlu0 %v1745_v24 }
 0x30a   : > { %1033 = vrot.lane.b32.xlu1 %v878_v26, %s3294_s7  ;;  %s3300_s7 = smov 24  }
 0x30e   : > { %1039 = vrot.lane.b32.xlu1 %v878_v26, %s3293_s26  ;;  %s3299_s26 = smov 8  }
 0x317   : > { %1036 = vrot.lane.b32.xlu0 %v878_v26, %s3295_s19 }
 0x386   : > { %v1741_v27 = vpop.xlane.xlu1 %1740  ;;  %v1738_v28 = vpop.xlane.xlu0 %1737 }
 0x387   : > { %v1749_v29 = vsub.f32 %v1733_v10, %v1741_v27  ;;  %v1748_v30 = vsub.f32 %v1732_v11, %v1738_v28 }
 0x389   : > { %v1754_v31 = vmul.f32 1.442695, %v1749_v29  ;;  %v1752_v32 = vmul.f32 1.442695, %v1748_v30 }
 0x38a   : > { %v1034_v33 = vpop.permute.xlu1 %1033  ;;  %v1744_v34 = vpop.xlane.xlu0 %1743 }
 0x38b   : > { %3022 = vpow2.f32 %v1754_v31  ;;  %v1750_v35 = vsub.f32 %v1734_v21, %v1744_v34 }
 0x38c   : > { %3024 = vpow2.f32 %v1752_v32 }
 0x38d   : > { %v1756_v36 = vmul.f32 1.442695, %v1750_v35 }
 0x38e   : > { %v1040_v37 = vpop.permute.xlu1 %1039  ;;  %v1747_v38 = vpop.xlane.xlu0 %1746 }
 0x38f   : > { %3026 = vpow2.f32 %v1756_v36  ;;  %v1751_v39 = vsub.f32 %v1735_v23, %v1747_v38  ;;  %v1058_v41 = vcombine.low %v1034_v33, %v1040_v37  ;;  %v1059_v42 = vcombine.high %v1034_v33, %v1040_v37 }
 0x391   : > { %v1758_v43 = vmul.f32 1.442695, %v1751_v39  ;;  %v1066_v49 = vrot.slane %v1058_v41, %v3716_v40  ;;  %v1073_v50 = vrot.slane %v1059_v42, %v3716_v40 }
 0x392   : > { %v1037_v44 = vpop.permute.xlu0 %1036 }
 0x393   : > { %3028 = vpow2.f32 %v1758_v43  ;;  %v1042_v45 = vcombine.low %v878_v26, %v1037_v44  ;;  %v1043_v47 = vcombine.high %v878_v26, %v1037_v44 }
 0x395   : > { %v3788_v48 = vpop.eup %3022  ;;  %v1050_v51 = vrot.slane %v1042_v45, %v3716_v40  ;;  %v1057_v52 = vrot.slane %v1043_v47, %v3716_v40 }
 0x396   : > { %v3025_v53 = vpop.eup %3024  ;;  %v1763_v54 = vsel %vm1027_vm2, %v3788_v48, 0.0 }
 0x397   : > { %v1074_v55 = vcombine.low %v1050_v51, %v1066_v49  ;;  %v1075_v56 = vcombine.high %v1050_v51, %v1066_v49  ;;  %v1090_v57 = vcombine.low %v1057_v52, %v1073_v50  ;;  %v1091_v58 = vcombine.high %v1057_v52, %v1073_v50  ;;  %1764 = vadd.xlane.f32.xlu0 %v1763_v54 }
 0x398   : > { %v1760_v59 = vsel %vm1027_vm2, %v3025_v53, 0.0 }
 0x399   : > { %v3027_v60 = vpop.eup %3026  ;;  %v1082_v61 = vrot.slane %v1074_v55, %v3718_v46  ;;  %v1089_v62 = vrot.slane %v1075_v56, %v3718_v46  ;;  %v1098_v63 = vrot.slane %v1090_v57, %v3718_v46  ;;  %v1105_v2 = vrot.slane %v1091_v58, %v3718_v46  ;;  %1761 = vadd.xlane.f32.xlu1 %v1760_v59 }
 0x39a   : > { %v1766_v3 = vsel %vm1027_vm2, %v3027_v60, 0.0 }
 0x39b   : > { %v1110_v4 = vcombine.low %v1082_v61, %v1089_v62  ;;  %v2700_v5 = vcombine.high %v1082_v61, %v1089_v62  ;;  %v1126_v6 = vcombine.low %v1098_v63, %v1105_v2  ;;  %v2701_v7 = vcombine.high %v1098_v63, %v1105_v2  ;;  %1767 = vadd.xlane.f32.xlu0 %v1766_v3 }
 0x39d   : > { %v3029_v8 = vpop.eup %3028  ;;  %v1117_v9 = vrot.slane %v1110_v4, %v3716_v40  ;;  %v1125_v10 = vrot.slane %v2700_v5, %v3716_v40  ;;  %v1133_v11 = vrot.slane %v1126_v6, %v3716_v40  ;;  %v1141_v12 = vrot.slane %v2701_v7, %v3716_v40 }
 0x39e   : > { %v1769_v13 = vsel %vm1027_vm2, %v3029_v8, 0.0 }
 0x39f   : > { %v1142_v14 = vcombine.low %v1117_v9, %v1125_v10  ;;  %v1143_v16 = vcombine.high %v1117_v9, %v1125_v10  ;;  %v1158_v17 = vcombine.low %v1133_v11, %v1141_v12  ;;  %v1159_v18 = vcombine.high %v1133_v11, %v1141_v12  ;;  %1770 = vadd.xlane.f32.xlu1 %v1769_v13 }
 0x3a1   : > { %v1150_v19 = vrot.slane %v1142_v14, %v3718_v46  ;;  %v1157_v20 = vrot.slane %v1143_v16, %v3718_v46  ;;  %v1166_v21 = vrot.slane %v1158_v17, %v3718_v46  ;;  %v1173_v22 = vrot.slane %v1159_v18, %v3718_v46 }
 0x3a3   : > { %v1174_v23 = vcombine.low %v1150_v19, %v1166_v21  ;;  %v1175_v24 = vcombine.high %v1150_v19, %v1166_v21  ;;  %v1176_v25 = vcombine.low %v1157_v20, %v1173_v22  ;;  %v1177_v26 = vcombine.high %v1157_v20, %v1173_v22 }
 0x3a5   : > { %1178 = vst.msk [vmem:[#allocation3] sm:$0xff] %vm1027_vm2, %v1174_v23  ;;  %1179 = vst.msk [vmem:[#allocation3 + $0x8] sm:$0xff] %vm1027_vm2, %v1175_v24 }
 0x3a6   : > { %1180 = vst.msk [vmem:[#allocation3 + $0x10] sm:$0xff] %vm1027_vm2, %v1176_v25  ;;  %1181 = vst.msk [vmem:[#allocation3 + $0x18] sm:$0xff] %vm1027_vm2, %v1177_v26 }
 0x3ac   : > { %v1419_v27 = vld [vmem:[#allocation3] sm:$0xff]  ;;  %v1420_v28 = vld [vmem:[#allocation3 + $0x8] sm:$0xff] }
 0x3ad   : > { %2835 = vmatpush3.msra.mxu0 %v1419_v27  ;;  %2840 = vmatpush3.msra.mxu1 %v1420_v28  ;;  %v1422_v37 = vld [vmem:[#allocation3 + $0x18] sm:$0xff]  ;;  %v1421_v41 = vld [vmem:[#allocation3 + $0x10] sm:$0xff] }
 0x3ae   : > { %2844 = vmatprep.subr.mxu0 %v3292_v1  ;;  %2849 = vmatprep.subr.mxu1 %v3292_v1 }
 0x424   : > { %v1765_v29 = vpop.xlane.xlu0 %1764 }
 0x425   : > { %3030 = vrcp.f32 %v1765_v29 }
 0x426   : > { %v1762_v30 = vpop.xlane.xlu1 %1761 }
 0x427   : > { %3032 = vrcp.f32 %v1762_v30 }
 0x428   : > { %v1768_v31 = vpop.xlane.xlu0 %1767 }
 0x429   : > { %3034 = vrcp.f32 %v1768_v31 }
 0x42c   : > { %v1771_v32 = vpop.xlane.xlu1 %1770 }
 0x42d   : > { %3036 = vrcp.f32 %v1771_v32 }
 0x42f   : > { %v3031_v33 = vpop.eup %3030 }
 0x430   : > { %v1775_v34 = vmul.f32 %v3031_v33, %v3788_v48 }
 0x431   : > { %v3033_v35 = vpop.eup %3032 }
 0x432   : > { %v1773_v36 = vmul.f32 %v3033_v35, %v3025_v53  ;;  %1781 = vst.msk [vmem:[%s3819_s0 + $0x8] sm:$0xff] %vm1027_vm2, %v1775_v34  ;;  %2842 = vmatmul.mubr.msk.f32.vlgmr.msra.gmra.mrb[6].mxu1 %vm1027_vm2, %v1775_v34  ;;  %v2263_v34 = vld [vmem:[#allocation10] sm:$0xff]  ;;  %v2264_v35 = vld [vmem:[#allocation10 + $0x8] sm:$0xff] }
 0x433   : > { %v3035_v38 = vpop.eup %3034  ;;  %2850 = vmatpush3.msra.mxu1 %v1422_v37  ;;  %2851 = vmatprep.mubr.msk.f32.mxu1 %vm3291_vm0, %v3292_v1  ;;  %v2903_v37 = vpack.c.bf16 %v2264_v35, %v2263_v34 }
 0x434   : > { %1780 = vst.msk [vmem:[%s3819_s0] sm:$0xff] %vm1027_vm2, %v1773_v36  ;;  %v1777_v39 = vmul.f32 %v3035_v38, %v3027_v60  ;;  %2837 = vmatmul.mubr.msk.f32.vlgmr.msra.gmra.mrb[8].mxu0 %vm1027_vm2, %v1773_v36  ;;  %2908 = vmatprep.subr.bf16.mxu1 %v3290_v0  ;;  %v2265_v36 = vld [vmem:[#allocation10 + $0x10] sm:$0xff]  ;;  %v2266_v38 = vld [vmem:[#allocation10 + $0x18] sm:$0xff] }
 0x435   : > { %2845 = vmatpush3.msra.mxu0 %v1421_v41  ;;  %2846 = vmatprep.mubr.msk.f32.mxu0 %vm3291_vm0, %v3292_v1  ;;  %v2348_v41 = vld [vmem:[%s4097_s18] sm:$0xff] }
 0x436   : > { %1782 = vst.msk [vmem:[%s3819_s0 + $0x10] sm:$0xff] %vm1027_vm2, %v1777_v39  ;;  %2902 = vmatprep.subr.bf16.mxu0 %v3290_v0 }
 0x437   : > { %v3037_v42 = vpop.eup %3036 }
 0x438   : > { %v1779_v43 = vmul.f32 %v3037_v42, %v3029_v8  ;;  %2847 = vmatmul.mubr.msk.f32.vlgmr.msra.gmra.mrb[10].mxu0 %vm1027_vm2, %v1777_v39  ;;  %v2906_v39 = vpack.c.bf16 %v2266_v38, %v2265_v36  ;;  %v2349_v42 = vld [vmem:[%s4097_s18 + $0x8] sm:$0xff] }
 0x439   : > { %2862 = vmatprep.mubr.msk.f32.mxu0 %vm3291_vm0, %v3292_v1  ;;  %2904 = vmatpush3.bf16.msra.mxu0 %v2903_v37 }
 0x43a   : > { %1783 = vst.msk [vmem:[%s3819_s0 + $0x18] sm:$0xff] %vm1027_vm2, %v1779_v43  ;;  %2852 = vmatmul.mubr.msk.f32.vlgmr.msra.gmra.mrb[8].mxu1 %vm1027_vm2, %v1779_v43  ;;  %2905 = vmatprep.subr.bf16.mxu0 %v3290_v0  ;;  %v2350_v43 = vld [vmem:[%s4097_s18 + $0x10] sm:$0xff] }
 0x43b   : > { %2881 = vmatprep.mubr.msk.f32.mxu1 %vm3291_vm0, %v3292_v1 }
 0x43d   : > { %2907 = vmatpush3.bf16.msra.mxu0 %v2906_v39 }
 0x505   : > { %v1926_v44 = vpop.f32.mrb[6].mxu1 }
 0x506   : > { %v2843_v45 = vpop.f32.mrb[7].mxu1 }
 0x507   : > { %v1853_v47 = vpop.f32.mrb[8].mxu0  ;;  %v2351_v45 = vld [vmem:[%s4097_s18 + $0x18] sm:$0xff] }
 0x508   : > { %v2838_v48 = vpop.f32.mrb[9].mxu0 }
 0x509   : > { %v2352_v48 = vld [vmem:[%s4097_s18 + $0x20] sm:$0xff] }
 0x50b   : > { %v1999_v49 = vpop.f32.mrb[10].mxu0 }
 0x50c   : > { %v2076_v50 = vcombine.low %v1853_v47, %v1999_v49  ;;  %v2077_v51 = vcombine.high %v1853_v47, %v1999_v49  ;;  %v2848_v52 = vpop.f32.mrb[11].mxu0  ;;  %v2912_v47 = vpack.c.bf16 %v2351_v45, %v2350_v43  ;;  %v2353_v49 = vld [vmem:[%s4097_s18 + $0x28] sm:$0xff] }
 0x50d   : > { %v2072_v53 = vpop.f32.mrb[8].mxu1 }
 0x50e   : > { %v2092_v54 = vcombine.low %v1926_v44, %v2072_v53  ;;  %v2093_v55 = vcombine.high %v1926_v44, %v2072_v53  ;;  %v2853_v56 = vpop.f32.mrb[9].mxu1  ;;  %v2084_v57 = vrot.slane %v2076_v50, %v3716_v40  ;;  %v2091_v58 = vrot.slane %v2077_v51, %v3716_v40 }
 0x50f   : > { %v2909_v44 = vpack.c.bf16 %v2349_v42, %v2348_v41  ;;  %v2915_v50 = vpack.c.bf16 %v2353_v49, %v2352_v48 }
 0x510   : > { %v2100_v59 = vrot.slane %v2092_v54, %v3716_v40  ;;  %v2107_v1 = vrot.slane %v2093_v55, %v3716_v40 }
 0x511   : > { %2910 = vmatpush3.bf16.msra.mxu1 %v2909_v44 }
 0x512   : > { %v2108_v60 = vcombine.low %v2084_v57, %v2100_v59  ;;  %v2109_v61 = vcombine.high %v2084_v57, %v2100_v59  ;;  %v2124_v62 = vcombine.low %v2091_v58, %v2107_v1  ;;  %v2125_v63 = vcombine.high %v2091_v58, %v2107_v1  ;;  %2911 = vmatprep.subr.bf16.mxu1 %v3290_v0 }
 0x514   : > { %v2116_v2 = vrot.slane %v2108_v60, %v3718_v46  ;;  %v2123_v3 = vrot.slane %v2109_v61, %v3718_v46  ;;  %v2132_v4 = vrot.slane %v2124_v62, %v3718_v46  ;;  %v2139_v5 = vrot.slane %v2125_v63, %v3718_v46  ;;  %v2720_v60 = vld [vmem:[%s4098_s4] ss:$0 sm:$0xff]  ;;  %s2505_s4 = sshll.u32 %s3819_s0, 4  ;;  %s3166_s0 = scalar_lea.vmem %s3165_s27, 1024  ;;  %s3917_s4 = int_to_ptr.vmem [resolvable:$true] %s2505_s4 }
 0x515   : > { %2913 = vmatpush3.bf16.msra.mxu1 %v2912_v47  ;;  %s3160_s16 = scalar_lea.vmem %s3917_s4, 512  ;;  %p3167_p3 = scmp.lt.s32.totalorder %s3917_s4, %s3165_s27 }
 0x516   : > { %v2144_v6 = vcombine.low %v2116_v2, %v2123_v3  ;;  %v2718_v7 = vcombine.high %v2116_v2, %v2123_v3  ;;  %v2160_v8 = vcombine.low %v2132_v4, %v2139_v5  ;;  %v2719_v9 = vcombine.high %v2132_v4, %v2139_v5  ;;  %2914 = vmatprep.subr.bf16.mxu1 %v3290_v0  ;;  %v2354_v3 = vld [vmem:[%s4097_s18 + $0x30] sm:$0xff]  ;;  %v2355_v4 = vld [vmem:[%s4097_s18 + $0x38] sm:$0xff]  ;;  %p3161_p5 = scmp.ne.s32.totalorder %s3917_s4, %s3160_s16  ;;  %p3168_p6 = scmp.lt.s32.totalorder %s3166_s0, %s3160_s16 }
 0x517   : > { %v2918_v5 = vpack.c.bf16 %v2355_v4, %v2354_v3 }
 0x518   : > { %v2151_v10 = vrot.slane %v2144_v6, %v3716_v40  ;;  %v2159_v11 = vrot.slane %v2718_v7, %v3716_v40  ;;  %v2167_v12 = vrot.slane %v2160_v8, %v3716_v40  ;;  %v2175_v13 = vrot.slane %v2719_v9, %v3716_v40  ;;  %v2722_v6 = vld [vmem:[%s4100_s15] ss:$0 sm:$0xff]  ;;  %p3162_p13 = pnand %p3161_p5, %p4105_p10  ;;  %p3169_p8 = por %p3168_p6, %p3167_p3 }
 0x519   : > { %2916 = vmatpush3.bf16.msra.mxu1 %v2915_v50 }
 0x51a   : > { %v2177_v14 = vcombine.high %v2151_v10, %v2159_v11  ;;  %v2193_v16 = vcombine.high %v2167_v12, %v2175_v13  ;;  %v2176_v17 = vcombine.low %v2151_v10, %v2159_v11  ;;  %v2192_v18 = vcombine.low %v2167_v12, %v2175_v13  ;;  %2917 = vmatprep.subr.bf16.mxu1 %v3290_v0  ;;  %v2721_v0 = vld [vmem:[%s4099_s21] ss:$0 sm:$0xff]  ;;  %s4104_s21 = sld [smem:[#allocation42_spill]]  ;;  %p3163_p7 = pneg %p3162_p13 }
 0x51b   : > { %v2724_v10 = vld [vmem:[%s4102_s8] ss:$0 sm:$0xff] }
 0x51c   : > { %v2191_v19 = vrot.slane %v2177_v14, %v3718_v46  ;;  %v2207_v20 = vrot.slane %v2193_v16, %v3718_v46  ;;  %v2184_v21 = vrot.slane %v2176_v17, %v3718_v46  ;;  %v2200_v22 = vrot.slane %v2192_v18, %v3718_v46  ;;  %p3170_p12 = pnand %p3169_p8, %p3163_p7 }
 0x51d   : > { %2919 = vmatpush3.bf16.msra.mxu1 %v2918_v5 }
 0x51e   : > { %v2210_v23 = vcombine.low %v2191_v19, %v2207_v20  ;;  %v2209_v24 = vcombine.high %v2184_v21, %v2200_v22  ;;  %v2211_v25 = vcombine.high %v2191_v19, %v2207_v20  ;;  %v2208_v26 = vcombine.low %v2184_v21, %v2200_v22 }
 0x520   : > { %2217 = vrot.lane.b32.xlu1 %v2210_v23, %s3298_s24  ;;  %2213 = vrot.lane.b32.xlu0 %v2209_v24, %s3299_s26  ;;  %s3915_s10 = scalar_lea.hbm %s4104_s21, %s2735_s11 }
 0x524   : > { %2221 = vrot.lane.b32.xlu1 %v2211_v25, %s3300_s7 }
 0x592   : > { %v2218_v40 = vpop.permute.xlu1 %2217  ;;  %v2214_v27 = vpop.permute.xlu0 %2213 }
 0x593   : > { %v2224_v28 = vsel %vm1027_vm2, %v2208_v26, %v2214_v27 }
 0x594   : > { %v2226_v30 = vsel %vm2225_vm3, %v2224_v28, %v2218_v40 }
 0x596   : > { %v2222_v29 = vpop.permute.xlu1 %2221 }
 0x597   : > { %v2228_v46 = vsel %vm2227_vm4, %v2226_v30, %v2222_v29 }
 0x598   : > { %v2231_v31 = vsel %vm726_vm1, %v2228_v46, 0.0  ;;  %v2236_v32 = vmul.f32 %v2228_v46, %v2228_v46 }
 0x599   : > { %2232 = vadd.xlane.f32.xlu0 %v2231_v31 }
 0x59a   : > { %v2237_v33 = vsel %vm726_vm1, %v2236_v32, 0.0 }
 0x59b   : > { %2238 = vadd.xlane.f32.xlu1 %v2237_v33 }
 0x626   : > { %v2233_v51 = vpop.xlane.xlu0 %2232 }
 0x627   : > { %v2235_v52 = vmul.f32 0.03125, %v2233_v51 }
 0x628   : > { %v2239_v53 = vpop.xlane.xlu1 %2238 }
 0x629   : > { %v2241_v54 = vmul.f32 %v2235_v52, %v2235_v52  ;;  %v2240_v55 = vmul.f32 0.03125, %v2239_v53  ;;  %v2244_v59 = vsub.f32 %v2228_v46, %v2235_v52 }
 0x62b   : > { %v2242_v56 = vsub.f32 %v2240_v55, %v2241_v54 }
 0x62d   : > { %v2243_v57 = vmax.f32 %v2242_v56, 0.0 }
 0x62f   : > { %v2245_v58 = vadd.f32 1e-12, %v2243_v57 }
 0x631   : > { %3038 = vrsqrt.f32 %v2245_v58 }
 0x63b   : > { %v3039_v1 = vpop.eup %3038 }
 0x63c   : > { %v2247_v61 = vmul.f32 %v3039_v1, %v2244_v59 }
 0x63e   : > { %v2254_v62 = vmul.f32 %v2720_v60, %v2247_v61 }
 0x640   : > { %v2261_v63 = vadd.f32 %v2721_v0, %v2254_v62 }
 0x642   : > { %v3892_v2 = vadd.f32 %v2261_v63, %v3680_v15 }
 0x644   : > { %2863 = vmatmul.mubr.msk.f32.vlgmr.msra.gmra.mrb[12].mxu0 %vm726_vm1, %v3892_v2 }
 0x717   : > { %v2343_v15 = vpop.f32.mrb[12].mxu0 }
 0x718   : > { %v2344_v7 = vadd.f32 %v2722_v6, %v2343_v15  ;;  %v2864_v8 = vpop.f32.mrb[13].mxu0 }
 0x71a   : > { %v2347_v9 = vmax.f32 %v2344_v7, 0.0 }
 0x71c   : > { %2882 = vmatmul.mubr.msk.f32.vlgmr.msra.gmra.mrb[10].mxu1 %vm2363_vm5, %v2347_v9 }
 0x7ef   : > { %v2433_v11 = vpop.f32.mrb[10].mxu1 }
 0x7f0   : > { %v2434_v12 = vadd.f32 %v2724_v10, %v2433_v11  ;;  %v2883_v13 = vpop.f32.mrb[11].mxu1 }
 0x7f2   : > { %v2439_v14 = vsel %vm726_vm1, %v2434_v12, 0.0  ;;  %v2443_v16 = vmul.f32 %v2434_v12, %v2434_v12 }
 0x7f3   : > { %2440 = vadd.xlane.f32.xlu0 %v2439_v14 }
 0x7f4   : > { %v2444_v17 = vsel %vm726_vm1, %v2443_v16, 0.0 }
 0x7f7   : > { %2445 = vadd.xlane.f32.xlu0 %v2444_v17 }
 0x7f8   : > { %3173 = shalt.err (!%p3170_p12)
}
 0x7f9   : > { %s3174_s19 = scalar_lea.hbm %s3915_s10, 512  ;;  %s3178_s23 = scalar_lea.hbm %s4104_s21, 1024 }
 0x7fa   : > { %p3175_p0 = scmp.ne.s32.totalorder %s3915_s10, %s3174_s19  ;;  %p3179_p9 = scmp.lt.u32.totalorder %s3915_s10, %s4104_s21 }
 0x7fb   : > { %p3180_p4 = scmp.lt.u32.totalorder %s3178_s23, %s3174_s19  ;;  %p3182_p5 = scmp.lt.u32.totalorder %s3174_s19, %s3915_s10 }
 0x7fc   : > { %p3176_p11 = pnand %p3175_p0, %p4105_p10 }
 0x7fd   : > { %p3181_p2 = por %p3180_p4, %p3179_p9 }
 0x7fe   : > { %p3177_p1 = pneg %p3176_p11 }
 0x7ff   : > { %p3183_p13 = por %p3182_p5, %p3181_p2 }
 0x801   : > { %p3184_p7 = pnand %p3183_p13, %p3177_p1 }
 0x803   : > { %3187 = shalt.err (!%p3184_p7)
}
 0x804   : > { %s3302_s24 = smov 128   ;;  %s4106_s25 = sld [smem:[#allocation39_spill]] }
 0x805   : > { %2931 = dma.vmem_to_hbm [thread:$0]  (%p4105_p10), %s3917_s4, 512, %s3915_s10, %s2477_s30, %s3302_s24, %s3302_s24, %s3299_s26  }
 0x806   : > { %s4107_s10 = sld [smem:[#allocation40_spill]]  ;;  %s2730_s30 = sshll.u32 %s4101_s1, 7 }
 0x807   : > { %s702_s27 = scalar_lea.vmem [#allocation12], %s3623_s12  ;;  %s4108_s2 = sld [smem:[#allocation41_spill]] }
 0x808   : > { %s2491_s0 = sshll.u32 %s702_s27, 4  ;;  %s2472_s8 = scalar_lea.sflag [#allocation6], %s3620_s20  ;;  %s3958_s0 = int_to_ptr.vmem [resolvable:$true] %s2491_s0 }
 0x809   : > { %s3188_s11 = scalar_lea.vmem %s3958_s0, 128  ;;  %s3303_s12 = smov [#allocation12]  }
 0x80a   : > { %v2726_v27 = vld [vmem:[%s4106_s25] ss:$0 sm:$0xff]  ;;  %p3189_p3 = scmp.ne.s32.totalorder %s3958_s0, %s3188_s11  ;;  %s3192_s1 = sshll.u32 %s3303_s12, 4  ;;  %s3193_s1 = int_to_ptr.vmem [resolvable:$false] %s3192_s1 }
 0x80b   : > { %s3194_s24 = scalar_lea.vmem %s3193_s1, 256  ;;  %p3195_p12 = scmp.lt.s32.totalorder %s3958_s0, %s3193_s1 }
 0x80c   : > { %v2727_v29 = vld [vmem:[%s4107_s10] ss:$0 sm:$0xff]  ;;  %p3190_p6 = pnand %p3189_p3, %p4105_p10  ;;  %p3196_p0 = scmp.lt.s32.totalorder %s3194_s24, %s3188_s11 }
 0x80d   : > { %s3956_s23 = scalar_lea.hbm %s4108_s2, %s2730_s30 }
 0x80e   : > { %p3191_p8 = pneg %p3190_p6  ;;  %p3197_p11 = por %p3196_p0, %p3195_p12 }
 0x810   : > { %p3198_p1 = pnand %p3197_p11, %p3191_p8 }
 0x880   : > { %v2441_v18 = vpop.xlane.xlu0 %2440 }
 0x881   : > { %v2442_v19 = vmul.f32 0.03125, %v2441_v18 }
 0x883   : > { %v2448_v21 = vmul.f32 %v2442_v19, %v2442_v19  ;;  %v2451_v26 = vsub.f32 %v2434_v12, %v2442_v19 }
 0x884   : > { %v2446_v20 = vpop.xlane.xlu0 %2445 }
 0x885   : > { %v2447_v22 = vmul.f32 0.03125, %v2446_v20 }
 0x887   : > { %v2449_v23 = vsub.f32 %v2447_v22, %v2448_v21 }
 0x889   : > { %v2450_v24 = vmax.f32 %v2449_v23, 0.0 }
 0x88b   : > { %v2452_v25 = vadd.f32 1e-12, %v2450_v24 }
 0x88d   : > { %3040 = vrsqrt.f32 %v2452_v25 }
 0x897   : > { %v3041_v40 = vpop.eup %3040 }
 0x898   : > { %v2454_v28 = vmul.f32 %v3041_v40, %v2451_v26 }
 0x89a   : > { %v2461_v30 = vmul.f32 %v2726_v27, %v2454_v28 }
 0x89c   : > { %v2468_v46 = vadd.f32 %v2727_v29, %v2461_v30 }
 0x89e   : > { %v2469_v31 = vadd.f32 %v2468_v46, %v3892_v2 }
 0x8a0   : > { %2470 = vst.msk [vmem:[%s702_s27] sm:$0xff] %vm726_vm1, %v2469_v31 }
 0x8a1   : > { %3201 = shalt.err (!%p3198_p1)
}
 0x8a2   : > { %s3202_s20 = scalar_lea.hbm %s3956_s23, 128  ;;  %s3206_s25 = scalar_lea.hbm %s4108_s2, 256 }
 0x8a3   : > { %p3203_p9 = scmp.ne.s32.totalorder %s3956_s23, %s3202_s20  ;;  %p3207_p5 = scmp.lt.u32.totalorder %s3956_s23, %s4108_s2 }
 0x8a4   : > { %p3208_p13 = scmp.lt.u32.totalorder %s3206_s25, %s3202_s20  ;;  %p3210_p3 = scmp.lt.u32.totalorder %s3202_s20, %s3956_s23 }
 0x8a5   : > { %p3204_p4 = pnand %p3203_p9, %p4105_p10 }
 0x8a6   : > { %p3209_p7 = por %p3208_p13, %p3207_p5 }
 0x8a7   : > { %p3205_p2 = pneg %p3204_p4 }
 0x8a8   : > { %p3211_p6 = por %p3210_p3, %p3209_p7 }
 0x8aa   : > { %p3212_p8 = pnand %p3211_p6, %p3205_p2 }
 0x8ac   : > { %3215 = shalt.err (!%p3212_p8)
}
 0x8ad   : > { %2930 = dma.vmem_to_hbm [thread:$0]  (%p4105_p10), %s3958_s0, 128, %s3956_s23, %s2472_s8  }
 0x8ae PF: > { %s4109_s10 = sld [smem:[#allocation20_spill]]  ;;  %s4110_s30 = sld [smem:[#allocation27_spill]] }
 0x8af   : > { %s4111_s27 = sld [smem:[#allocation23_spill]] }
 0x8b4   : > { %s2520_s19 = sand.u32 1, %s4109_s10   ;;  %p4112_p12 = scmp.ne.s32.totalorder %s4110_s30, 0 }
 0x8b5   : > { %p4113_p0 = scmp.ge.s32.totalorder %s4111_s27, 2  ;;  %s2521_s15 = scalar_lea.sflag [#allocation6], %s2520_s19 }
 0x8b7   : > { %p2949_p11 = pnand %p4113_p0, %p4112_p12 }
 0x8b9   : > { %3253 = dma.done.wait (!%p2949_p11), %s2521_s15, 128  }
 0x8ba   : > { %3255 = vsyncadd (!%p2949_p11), %s2521_s15, 4294967168  ;;  %s2530_s11 = scalar_lea.sflag [#allocation14], %s2520_s19 }
 0x8bb   : > { %3257 = dma.done.wait (!%p2949_p11), %s2530_s11, 512  }
 0x8bc   : > { %3259 = vsyncadd (!%p2949_p11), %s2530_s11, 4294966784  ;;  %s42_s19 = sadd.s32 1, %s4111_s27   ;;  %s4114_s17 = sld [smem:[#allocation25_spill]] }
 0x8bd   : > { %p39_p1 = scmp.ge.s32.totalorder %s42_s19, 4   ;;  %s4115_s30 = sld [smem:[#allocation22_spill]] }
 0x8be   : > { %s4116_s0 = sld [smem:[#allocation24_spill]]  ;;  %s4117_s27 = smov %s3266_s28 }
 0x8bf   : > { %s4118_s28 = smov %s3270_s29  ;;  %41 = sbr.rel (!%p39_p1) target bundleno = 27 (0x1b), region = 182 }
 0x8c2   : > { %s4119_s29 = smov %s4114_s17 }
 0x8c6   :  { %2535 = vsyncpa [#allocation5], 1 }
 0x8c7   :  { %2537 = vsyncpa [#allocation5 + $0x1], 1 }
 0x8c8   :  { %2538 = vsyncpa [#allocation8], 1 }
 0x8c9   :  { %2540 = vsyncpa [#allocation8 + $0x1], 1 }
 0x8ca   :  { %2541 = vsyncpa [#allocation11], 1 }
 0x8cb   :  { %2542 = vsyncpa [#allocation6], 1 }
 0x8cc   :  { %2544 = vsyncpa [#allocation6 + $0x1], 1 }
 0x8cd   :  { %2545 = vsyncpa [#allocation14], 1 }
 0x8ce   :  { %2547 = vsyncpa [#allocation14 + $0x1], 1 }

</bundles_post_ra>
